<compile_context>
chip_gen: v7x
topology: tpu7x:2x2x1
jax: 0.10.0
libtpu: 0.0.40
codegen_flags: <defaults>
</compile_context>

<pallas_src>
import math
from functools import partial

import jax
import jax.numpy as jnp
from jax.experimental import pallas as pl
from jax.experimental.pallas import tpu as pltpu

# ----------------------------- config ---------------------------------------
VOCAB = 100
HIDDEN = 32
N_LAYERS = 2
N_HEADS = 4
HEAD_DIM = HIDDEN // N_HEADS
INTERMEDIATE = 64
MAX_POS = 16
TYPE_VOCAB = 2
LN_EPS = 1e-12            # BERT LayerNorm eps
BATCH = 2
SEQ = 16

ACT_DTYPE = jnp.bfloat16  # activation / matmul-weight dtype (f32 accumulation)

# Rows of tokens per matmul grid step.  Production (bert-base, B*S in the
# thousands): 256-512 to feed the 256-wide MXU on v6e/v7x and keep the
# double-buffered tiles inside v7x's 64 MiB VMEM.  Toy config here: 16, so the
# M-tiled / pipelined grid path is actually exercised (grid=(2,) with B*S=32)
# while staying bf16 sublane-aligned.
TM_TARGET = 16


def _pick_tm(M, target=TM_TARGET):
    """Largest multiple of 16 that divides M and is <= target (fallback: M)."""
    tm = min(target, M)
    tm -= tm % 16
    while tm >= 16:
        if M % tm == 0:
            return tm
        tm -= 16
    return M


# ----------------------------- Pallas kernels -------------------------------
def _layernorm_kernel(x_ref, g_ref, b_ref, o_ref):
    """o = LayerNorm(x) * gamma + beta (no residual), f32 statistics."""
    x = x_ref[...].astype(jnp.float32)
    mu = jnp.mean(x, axis=-1, keepdims=True)
    var = jnp.mean((x - mu) * (x - mu), axis=-1, keepdims=True)
    inv = jax.lax.rsqrt(var + LN_EPS)
    o_ref[...] = ((x - mu) * inv * g_ref[...] + b_ref[...]).astype(o_ref.dtype)


def layernorm(x, gamma, beta, out_dtype):
    M, H = x.shape
    tm = _pick_tm(M)
    return pl.pallas_call(
        _layernorm_kernel,
        out_shape=jax.ShapeDtypeStruct((M, H), out_dtype),
        grid=(M // tm,),
        in_specs=[
            pl.BlockSpec((tm, H), lambda i: (i, 0)),
            pl.BlockSpec((1, H), lambda i: (0, 0)),
            pl.BlockSpec((1, H), lambda i: (0, 0)),
        ],
        out_specs=pl.BlockSpec((tm, H), lambda i: (i, 0)),
        compiler_params=pltpu.CompilerParams(dimension_semantics=("parallel",)),
    )(x, gamma.reshape(1, H), beta.reshape(1, H))


def _matmul_bias_kernel(x_ref, w_ref, b_ref, o_ref, *, activation):
    """o = act(x @ w + b); bf16 MXU inputs, f32 accumulation, f32 epilogue."""
    acc = jnp.dot(x_ref[...], w_ref[...], preferred_element_type=jnp.float32)
    acc = acc + b_ref[...]
    if activation == "gelu":
        # exact (erf) GELU, matching HF BERT's "gelu" activation (f32 math)
        acc = 0.5 * acc * (1.0 + jax.lax.erf(acc * (1.0 / math.sqrt(2.0))))
    o_ref[...] = acc.astype(o_ref.dtype)


def matmul_bias(x, w, b, activation="none", out_dtype=None):
    M, K = x.shape
    _, N = w.shape
    out_dtype = out_dtype or x.dtype
    tm = _pick_tm(M)
    return pl.pallas_call(
        partial(_matmul_bias_kernel, activation=activation),
        out_shape=jax.ShapeDtypeStruct((M, N), out_dtype),
        grid=(M // tm,),
        in_specs=[
            pl.BlockSpec((tm, K), lambda i: (i, 0)),   # activations: M-tiled
            pl.BlockSpec((K, N), lambda i: (0, 0)),    # weights: resident
            pl.BlockSpec((1, N), lambda i: (0, 0)),    # bias (f32)
        ],
        out_specs=pl.BlockSpec((tm, N), lambda i: (i, 0)),
        compiler_params=pltpu.CompilerParams(dimension_semantics=("parallel",)),
    )(x, w, b.reshape(1, N))


def _matmul_bias_res_ln_kernel(x_ref, w_ref, b_ref, res_ref, g_ref, bb_ref, o_ref):
    """o = LayerNorm(x @ w + b + residual) * gamma + beta (fused epilogue)."""
    acc = jnp.dot(x_ref[...], w_ref[...], preferred_element_type=jnp.float32)
    h = acc + b_ref[...] + res_ref[...].astype(jnp.float32)
    mu = jnp.mean(h, axis=-1, keepdims=True)
    var = jnp.mean((h - mu) * (h - mu), axis=-1, keepdims=True)
    inv = jax.lax.rsqrt(var + LN_EPS)
    o_ref[...] = ((h - mu) * inv * g_ref[...] + bb_ref[...]).astype(o_ref.dtype)


def matmul_bias_residual_layernorm(x, w, b, res, gamma, beta, out_dtype=None):
    M, K = x.shape
    _, N = w.shape
    out_dtype = out_dtype or res.dtype
    tm = _pick_tm(M)
    return pl.pallas_call(
        _matmul_bias_res_ln_kernel,
        out_shape=jax.ShapeDtypeStruct((M, N), out_dtype),
        grid=(M // tm,),
        in_specs=[
            pl.BlockSpec((tm, K), lambda i: (i, 0)),
            pl.BlockSpec((K, N), lambda i: (0, 0)),
            pl.BlockSpec((1, N), lambda i: (0, 0)),
            pl.BlockSpec((tm, N), lambda i: (i, 0)),   # residual: M-tiled
            pl.BlockSpec((1, N), lambda i: (0, 0)),
            pl.BlockSpec((1, N), lambda i: (0, 0)),
        ],
        out_specs=pl.BlockSpec((tm, N), lambda i: (i, 0)),
        compiler_params=pltpu.CompilerParams(dimension_semantics=("parallel",)),
    )(x, w, b.reshape(1, N), res, gamma.reshape(1, N), beta.reshape(1, N))


def _attention_kernel(qkv_ref, o_ref, *, n_heads, head_dim):
    """One batch element: multi-head softmax(q k^T) v, head split done in-kernel.

    qkv_ref block: (1, S, 3H) bf16 (q | k | v concatenated on the lane axis).
    1/sqrt(Dh) is pre-folded into the frozen wq/bq, so no per-element scale.
    Output written lane-dense as (S, H).  No attention mask (all tokens valid).
    """
    H = n_heads * head_dim
    qkv = qkv_ref[0]                                     # (S, 3H)
    ctx_heads = []
    for h in range(n_heads):                             # static unroll over heads
        q = qkv[:, h * head_dim:(h + 1) * head_dim]              # (S, Dh) bf16
        k = qkv[:, H + h * head_dim:H + (h + 1) * head_dim]      # (S, Dh) bf16
        v = qkv[:, 2 * H + h * head_dim:2 * H + (h + 1) * head_dim]
        # q @ k^T via dot_general (contract last dims) -> no materialized k.T
        s = jax.lax.dot_general(q, k, (((1,), (1,)), ((), ())),
                                preferred_element_type=jnp.float32)  # (S, S) f32
        s = s - jnp.max(s, axis=-1, keepdims=True)
        p = jnp.exp(s)
        p = p * pl.reciprocal(jnp.sum(p, axis=-1, keepdims=True), approx=True)
        ctx_heads.append(jnp.dot(p.astype(v.dtype), v,
                                 preferred_element_type=jnp.float32))
    o_ref[0] = jnp.concatenate(ctx_heads, axis=-1).astype(o_ref.dtype)


def attention(qkv, batch, seq):
    """qkv: (B*S, 3H) -> context (B*S, H); grid over batch, heads in-kernel."""
    M, threeH = qkv.shape
    H = threeH // 3
    qkv3 = qkv.reshape(batch, seq, threeH)   # metadata reshape only
    out = pl.pallas_call(
        partial(_attention_kernel, n_heads=N_HEADS, head_dim=HEAD_DIM),
        out_shape=jax.ShapeDtypeStruct((batch, seq, H), qkv.dtype),
        grid=(batch,),
        in_specs=[pl.BlockSpec((1, seq, threeH), lambda b: (b, 0, 0))],
        out_specs=pl.BlockSpec((1, seq, H), lambda b: (b, 0, 0)),
        compiler_params=pltpu.CompilerParams(dimension_semantics=("parallel",)),
    )(qkv3)
    # TODO(synk): for long sequences, tile queries flash-style (online softmax)
    # inside this kernel and fuse the whole encoder layer into one pallas_call
    # with the layer weights resident in VMEM.
    return out.reshape(M, H)


# ----------------------------- parameters -----------------------------------
def init_params(key):
    """Deterministic synthetic frozen weights (same structure as bert-base)."""
    def nxt():
        nonlocal key
        key, sub = jax.random.split(key)
        return sub

    def dense(shape):
        return 0.02 * jax.random.normal(nxt(), shape, jnp.float32)

    params = {
        "word_emb": dense((VOCAB, HIDDEN)),
        "pos_emb": dense((MAX_POS, HIDDEN)),
        "type_emb": dense((TYPE_VOCAB, HIDDEN)),
        "emb_ln_g": jnp.ones((HIDDEN,), jnp.float32),
        "emb_ln_b": jnp.zeros((HIDDEN,), jnp.float32),
        "layers": [],
    }
    for _ in range(N_LAYERS):
        params["layers"].append({
            "wq": dense((HIDDEN, HIDDEN)), "bq": dense((HIDDEN,)),
            "wk": dense((HIDDEN, HIDDEN)), "bk": dense((HIDDEN,)),
            "wv": dense((HIDDEN, HIDDEN)), "bv": dense((HIDDEN,)),
            "wo": dense((HIDDEN, HIDDEN)), "bo": dense((HIDDEN,)),
            "attn_ln_g": jnp.ones((HIDDEN,), jnp.float32),
            "attn_ln_b": jnp.zeros((HIDDEN,), jnp.float32),
            "w1": dense((HIDDEN, INTERMEDIATE)), "b1": dense((INTERMEDIATE,)),
            "w2": dense((INTERMEDIATE, HIDDEN)), "b2": dense((HIDDEN,)),
            "out_ln_g": jnp.ones((HIDDEN,), jnp.float32),
            "out_ln_b": jnp.zeros((HIDDEN,), jnp.float32),
        })
    return params


def pack_params(raw):
    """One-time pre-pack of the frozen weights:
       - concat wq|wk|wv -> W_qkv (H, 3H); fold 1/sqrt(Dh) into the q slice,
       - cast matmul weights to bf16 (f32 accumulation happens in-kernel),
       - biases / LN params stay f32 (used in the f32 epilogues)."""
    scale = 1.0 / math.sqrt(HEAD_DIM)
    packed = {
        "word_emb": raw["word_emb"],
        "pos_emb": raw["pos_emb"],
        "type_emb": raw["type_emb"],
        "emb_ln_g": raw["emb_ln_g"],
        "emb_ln_b": raw["emb_ln_b"],
        "layers": [],
    }
    for lyr in raw["layers"]:
        w_qkv = jnp.concatenate(
            [lyr["wq"] * scale, lyr["wk"], lyr["wv"]], axis=1).astype(ACT_DTYPE)
        b_qkv = jnp.concatenate(
            [lyr["bq"] * scale, lyr["bk"], lyr["bv"]], axis=0).astype(jnp.float32)
        packed["layers"].append({
            "w_qkv": w_qkv, "b_qkv": b_qkv,
            "wo": lyr["wo"].astype(ACT_DTYPE), "bo": lyr["bo"],
            "attn_ln_g": lyr["attn_ln_g"], "attn_ln_b": lyr["attn_ln_b"],
            "w1": lyr["w1"].astype(ACT_DTYPE), "b1": lyr["b1"],
            "w2": lyr["w2"].astype(ACT_DTYPE), "b2": lyr["b2"],
            "out_ln_g": lyr["out_ln_g"], "out_ln_b": lyr["out_ln_b"],
        })
    return packed


# ----------------------------- forward (FrozenBert.forward) -----------------
def frozen_bert_forward(params, input_ids):
    """Returns last_hidden_state, shape (B, S, HIDDEN) — i.e. bert(x)[0]."""
    B, S = input_ids.shape
    M = B * S

    # Embeddings (gather is glue, done in plain JAX).
    word = params["word_emb"][input_ids]                      # (B, S, H)
    pos = params["pos_emb"][:S][None, :, :]                   # (1, S, H)
    typ = params["type_emb"][0][None, None, :]                # token_type_ids = 0
    emb = (word + pos + typ).reshape(M, HIDDEN)               # f32

    # Embedding LayerNorm (no-residual path — no zeros tensor).
    h = layernorm(emb, params["emb_ln_g"], params["emb_ln_b"], out_dtype=ACT_DTYPE)

    for lyr in params["layers"]:
        # ---- self-attention ----
        qkv = matmul_bias(h, lyr["w_qkv"], lyr["b_qkv"], out_dtype=ACT_DTYPE)
        ctx = attention(qkv, B, S)                            # (M, H) bf16
        # O-projection + residual + LayerNorm fused in one kernel.
        h = matmul_bias_residual_layernorm(
            ctx, lyr["wo"], lyr["bo"], h, lyr["attn_ln_g"], lyr["attn_ln_b"],
            out_dtype=ACT_DTYPE)

        # ---- feed-forward ----
        inter = matmul_bias(h, lyr["w1"], lyr["b1"], activation="gelu",
                            out_dtype=ACT_DTYPE)
        # Down-projection + residual + LayerNorm fused.
        h = matmul_bias_residual_layernorm(
            inter, lyr["w2"], lyr["b2"], h, lyr["out_ln_g"], lyr["out_ln_b"],
            out_dtype=ACT_DTYPE)

    return h.reshape(B, S, HIDDEN).astype(jnp.float32)


# ----------------------------- main ------------------------------------------
if __name__ == "__main__":
    root = jax.random.PRNGKey(0)
    pkey, xkey = jax.random.split(root)
    params = pack_params(init_params(pkey))
    input_ids = jax.random.randint(xkey, (BATCH, SEQ), 0, VOCAB, dtype=jnp.int32)

    fwd = jax.jit(frozen_bert_forward)
    out = fwd(params, input_ids)
    out = jax.block_until_ready(out)
    assert out.shape == (BATCH, SEQ, HIDDEN)
    assert out.dtype == jnp.float32
    assert bool(jnp.all(jnp.isfinite(out)))
    print("KERNEL_OK")
</pallas_src>

<mosaic_0001>
module attributes {stable_mosaic.version = 11 : i64} {
  func.func @_layernorm_kernel(%arg0: i32, %arg1: memref<16x32xf32, #tpu.memory_space<vmem>>, %arg2: memref<1x32xf32, #tpu.memory_space<vmem>>, %arg3: memref<1x32xf32, #tpu.memory_space<vmem>>, %arg4: memref<16x32xbf16, #tpu.memory_space<vmem>>) attributes {dimension_semantics = [#tpu.dimension_semantics<parallel>], iteration_bounds = array<i64: 2>, scalar_prefetch = 0 : i64, scratch_operands = 0 : i64, tpu.core_type = #tpu.core_type<tc>, window_params = [{transform_indices = @transform_0, window_bounds = array<i64: 16, 32>}, {pipeline_mode = #tpu.pipeline_mode<synchronous>, transform_indices = @transform_1, window_bounds = array<i64: 1, 32>}, {pipeline_mode = #tpu.pipeline_mode<synchronous>, transform_indices = @transform_2, window_bounds = array<i64: 1, 32>}, {transform_indices = @transform_3, window_bounds = array<i64: 16, 32>}]} {
    %c0 = arith.constant 0 : index
    %c0_0 = arith.constant 0 : index
    %0 = vector.load %arg1[%c0, %c0_0] : memref<16x32xf32, #tpu.memory_space<vmem>>, vector<16x32xf32>
    %cst = arith.constant dense<0.000000e+00> : vector<16xf32>
    %1 = vector.multi_reduction <add>, %0, %cst [1] : vector<16x32xf32> to vector<16xf32>
    %2 = vector.shape_cast %1 : vector<16xf32> to vector<16x1xf32>
    %cst_1 = arith.constant 3.200000e+01 : f32
    %3 = vector.broadcast %cst_1 : f32 to vector<16x1xf32>
    %4 = arith.divf %2, %3 : vector<16x1xf32>
    %5 = vector.broadcast %4 : vector<16x1xf32> to vector<16x32xf32>
    %6 = arith.subf %0, %5 : vector<16x32xf32>
    %7 = vector.broadcast %4 : vector<16x1xf32> to vector<16x32xf32>
    %8 = arith.subf %0, %7 : vector<16x32xf32>
    %9 = arith.mulf %6, %8 : vector<16x32xf32>
    %cst_2 = arith.constant dense<0.000000e+00> : vector<16xf32>
    %10 = vector.multi_reduction <add>, %9, %cst_2 [1] : vector<16x32xf32> to vector<16xf32>
    %11 = vector.shape_cast %10 : vector<16xf32> to vector<16x1xf32>
    %cst_3 = arith.constant 3.200000e+01 : f32
    %12 = vector.broadcast %cst_3 : f32 to vector<16x1xf32>
    %13 = arith.divf %11, %12 : vector<16x1xf32>
    %cst_4 = arith.constant 9.99999996E-13 : f32
    %14 = vector.broadcast %cst_4 : f32 to vector<16x1xf32>
    %15 = arith.addf %13, %14 : vector<16x1xf32>
    %16 = math.rsqrt %15 : vector<16x1xf32>
    %17 = vector.broadcast %4 : vector<16x1xf32> to vector<16x32xf32>
    %18 = arith.subf %0, %17 : vector<16x32xf32>
    %19 = vector.broadcast %16 : vector<16x1xf32> to vector<16x32xf32>
    %20 = arith.mulf %18, %19 : vector<16x32xf32>
    %c0_5 = arith.constant 0 : index
    %c0_6 = arith.constant 0 : index
    %21 = vector.load %arg2[%c0_5, %c0_6] : memref<1x32xf32, #tpu.memory_space<vmem>>, vector<1x32xf32>
    %22 = vector.broadcast %21 : vector<1x32xf32> to vector<16x32xf32>
    %23 = arith.mulf %20, %22 : vector<16x32xf32>
    %c0_7 = arith.constant 0 : index
    %c0_8 = arith.constant 0 : index
    %24 = vector.load %arg3[%c0_7, %c0_8] : memref<1x32xf32, #tpu.memory_space<vmem>>, vector<1x32xf32>
    %25 = vector.broadcast %24 : vector<1x32xf32> to vector<16x32xf32>
    %26 = arith.addf %23, %25 : vector<16x32xf32>
    %27 = arith.truncf %26 : vector<16x32xf32> to vector<16x32xbf16>
    %c0_9 = arith.constant 0 : index
    %c0_10 = arith.constant 0 : index
    %28 = vector.load %arg4[%c0_9, %c0_10] : memref<16x32xbf16, #tpu.memory_space<vmem>>, vector<16x32xbf16>
    tpu.vector_store %arg4[%c0_9, %c0_10], %27 {strides = array<i32>} : memref<16x32xbf16, #tpu.memory_space<vmem>>, vector<16x32xbf16>,
    return
  }
  func.func @transform_0(%arg0: i32) -> (i32, i32) {
    %c0_i32 = arith.constant 0 : i32
    %c0_i32_0 = arith.constant 0 : i32
    return %arg0, %c0_i32 : i32, i32
  }
  func.func @transform_1(%arg0: i32) -> (i32, i32) {
    %c0_i32 = arith.constant 0 : i32
    %c0_i32_0 = arith.constant 0 : i32
    %c0_i32_1 = arith.constant 0 : i32
    return %c0_i32, %c0_i32_0 : i32, i32
  }
  func.func @transform_2(%arg0: i32) -> (i32, i32) {
    %c0_i32 = arith.constant 0 : i32
    %c0_i32_0 = arith.constant 0 : i32
    %c0_i32_1 = arith.constant 0 : i32
    return %c0_i32, %c0_i32_0 : i32, i32
  }
  func.func @transform_3(%arg0: i32) -> (i32, i32) {
    %c0_i32 = arith.constant 0 : i32
    %c0_i32_0 = arith.constant 0 : i32
    return %arg0, %c0_i32 : i32, i32
  }
}

module attributes {stable_mosaic.version = 11 : i64} {
  func.func @_matmul_bias_kernel(%arg0: i32, %arg1: memref<16x32xbf16, #tpu.memory_space<vmem>>, %arg2: memref<32x96xbf16, #tpu.memory_space<vmem>>, %arg3: memref<1x96xf32, #tpu.memory_space<vmem>>, %arg4: memref<16x96xbf16, #tpu.memory_space<vmem>>) attributes {dimension_semantics = [#tpu.dimension_semantics<parallel>], iteration_bounds = array<i64: 2>, scalar_prefetch = 0 : i64, scratch_operands = 0 : i64, tpu.core_type = #tpu.core_type<tc>, window_params = [{transform_indices = @transform_0, window_bounds = array<i64: 16, 32>}, {pipeline_mode = #tpu.pipeline_mode<synchronous>, transform_indices = @transform_1, window_bounds = array<i64: 32, 96>}, {pipeline_mode = #tpu.pipeline_mode<synchronous>, transform_indices = @transform_2, window_bounds = array<i64: 1, 96>}, {transform_indices = @transform_3, window_bounds = array<i64: 16, 96>}]} {
    %c0 = arith.constant 0 : index
    %c0_0 = arith.constant 0 : index
    %0 = vector.load %arg1[%c0, %c0_0] : memref<16x32xbf16, #tpu.memory_space<vmem>>, vector<16x32xbf16>
    %c0_1 = arith.constant 0 : index
    %c0_2 = arith.constant 0 : index
    %1 = vector.load %arg2[%c0_1, %c0_2] : memref<32x96xbf16, #tpu.memory_space<vmem>>, vector<32x96xbf16>
    %cst = arith.constant dense<0.000000e+00> : vector<16x96xf32>
    %2 = tpu.matmul %0, %1, %cst {dimension_numbers = #tpu.dot_dimension_numbers<[1], [0], [0], [1], [0, 0, 1, 1], [], []>} : vector<16x32xbf16>, vector<32x96xbf16>, vector<16x96xf32> -> vector<16x96xf32>
    %c0_3 = arith.constant 0 : index
    %c0_4 = arith.constant 0 : index
    %3 = vector.load %arg3[%c0_3, %c0_4] : memref<1x96xf32, #tpu.memory_space<vmem>>, vector<1x96xf32>
    %4 = vector.broadcast %3 : vector<1x96xf32> to vector<16x96xf32>
    %5 = arith.addf %2, %4 : vector<16x96xf32>
    %6 = arith.truncf %5 : vector<16x96xf32> to vector<16x96xbf16>
    %c0_5 = arith.constant 0 : index
    %c0_6 = arith.constant 0 : index
    %7 = vector.load %arg4[%c0_5, %c0_6] : memref<16x96xbf16, #tpu.memory_space<vmem>>, vector<16x96xbf16>
    tpu.vector_store %arg4[%c0_5, %c0_6], %6 {strides = array<i32>} : memref<16x96xbf16, #tpu.memory_space<vmem>>, vector<16x96xbf16>,
    return
  }
  func.func @transform_0(%arg0: i32) -> (i32, i32) {
    %c0_i32 = arith.constant 0 : i32
    %c0_i32_0 = arith.constant 0 : i32
    return %arg0, %c0_i32 : i32, i32
  }
  func.func @transform_1(%arg0: i32) -> (i32, i32) {
    %c0_i32 = arith.constant 0 : i32
    %c0_i32_0 = arith.constant 0 : i32
    %c0_i32_1 = arith.constant 0 : i32
    return %c0_i32, %c0_i32_0 : i32, i32
  }
  func.func @transform_2(%arg0: i32) -> (i32, i32) {
    %c0_i32 = arith.constant 0 : i32
    %c0_i32_0 = arith.constant 0 : i32
    %c0_i32_1 = arith.constant 0 : i32
    return %c0_i32, %c0_i32_0 : i32, i32
  }
  func.func @transform_3(%arg0: i32) -> (i32, i32) {
    %c0_i32 = arith.constant 0 : i32
    %c0_i32_0 = arith.constant 0 : i32
    return %arg0, %c0_i32 : i32, i32
  }
}

module attributes {stable_mosaic.version = 11 : i64} {
  func.func @_attention_kernel(%arg0: i32, %arg1: memref<1x16x96xbf16, #tpu.memory_space<vmem>>, %arg2: memref<1x16x32xbf16, #tpu.memory_space<vmem>>) attributes {dimension_semantics = [#tpu.dimension_semantics<parallel>], iteration_bounds = array<i64: 2>, scalar_prefetch = 0 : i64, scratch_operands = 0 : i64, tpu.core_type = #tpu.core_type<tc>, window_params = [{transform_indices = @transform_0, window_bounds = array<i64: 1, 16, 96>}, {transform_indices = @transform_1, window_bounds = array<i64: 1, 16, 32>}]} {
    %c0 = arith.constant 0 : index
    %c0_0 = arith.constant 0 : index
    %c0_1 = arith.constant 0 : index
    %0 = vector.load %arg1[%c0, %c0_0, %c0_1] : memref<1x16x96xbf16, #tpu.memory_space<vmem>>, vector<1x16x96xbf16>
    %1 = vector.shape_cast %0 : vector<1x16x96xbf16> to vector<16x96xbf16>
    %2 = vector.extract_strided_slice %1 {offsets = [0, 0], sizes = [16, 8], strides = [1, 1]} : vector<16x96xbf16> to vector<16x8xbf16>
    %3 = vector.extract_strided_slice %1 {offsets = [0, 32], sizes = [16, 8], strides = [1, 1]} : vector<16x96xbf16> to vector<16x8xbf16>
    %4 = vector.extract_strided_slice %1 {offsets = [0, 64], sizes = [16, 8], strides = [1, 1]} : vector<16x96xbf16> to vector<16x8xbf16>
    %cst = arith.constant dense<0.000000e+00> : vector<16x16xf32>
    %5 = tpu.matmul %2, %3, %cst {dimension_numbers = #tpu.dot_dimension_numbers<[1], [1], [0], [0], [0, 0, 1, 0], [], []>} : vector<16x8xbf16>, vector<16x8xbf16>, vector<16x16xf32> -> vector<16x16xf32>
    %cst_2 = arith.constant dense<0xFF800000> : vector<16xf32>
    %6 = vector.multi_reduction <maximumf>, %5, %cst_2 [1] : vector<16x16xf32> to vector<16xf32>
    %7 = vector.shape_cast %6 : vector<16xf32> to vector<16x1xf32>
    %8 = vector.broadcast %7 : vector<16x1xf32> to vector<16x16xf32>
    %9 = arith.subf %5, %8 : vector<16x16xf32>
    %10 = math.exp %9 : vector<16x16xf32>
    %cst_3 = arith.constant dense<0.000000e+00> : vector<16xf32>
    %11 = vector.multi_reduction <add>, %10, %cst_3 [1] : vector<16x16xf32> to vector<16xf32>
    %12 = vector.shape_cast %11 : vector<16xf32> to vector<16x1xf32>
    %13 = tpu.reciprocal %12 {approx = true} : vector<16x1xf32> -> vector<16x1xf32>
    %14 = vector.broadcast %13 : vector<16x1xf32> to vector<16x16xf32>
    %15 = arith.mulf %10, %14 : vector<16x16xf32>
    %16 = arith.truncf %15 : vector<16x16xf32> to vector<16x16xbf16>
    %cst_4 = arith.constant dense<0.000000e+00> : vector<16x8xf32>
    %17 = tpu.matmul %16, %4, %cst_4 {dimension_numbers = #tpu.dot_dimension_numbers<[1], [0], [0], [1], [0, 0, 1, 1], [], []>} : vector<16x16xbf16>, vector<16x8xbf16>, vector<16x8xf32> -> vector<16x8xf32>
    %18 = vector.extract_strided_slice %1 {offsets = [0, 8], sizes = [16, 8], strides = [1, 1]} : vector<16x96xbf16> to vector<16x8xbf16>
    %19 = vector.extract_strided_slice %1 {offsets = [0, 40], sizes = [16, 8], strides = [1, 1]} : vector<16x96xbf16> to vector<16x8xbf16>
    %20 = vector.extract_strided_slice %1 {offsets = [0, 72], sizes = [16, 8], strides = [1, 1]} : vector<16x96xbf16> to vector<16x8xbf16>
    %cst_5 = arith.constant dense<0.000000e+00> : vector<16x16xf32>
    %21 = tpu.matmul %18, %19, %cst_5 {dimension_numbers = #tpu.dot_dimension_numbers<[1], [1], [0], [0], [0, 0, 1, 0], [], []>} : vector<16x8xbf16>, vector<16x8xbf16>, vector<16x16xf32> -> vector<16x16xf32>
    %cst_6 = arith.constant dense<0xFF800000> : vector<16xf32>
    %22 = vector.multi_reduction <maximumf>, %21, %cst_6 [1] : vector<16x16xf32> to vector<16xf32>
    %23 = vector.shape_cast %22 : vector<16xf32> to vector<16x1xf32>
    %24 = vector.broadcast %23 : vector<16x1xf32> to vector<16x16xf32>
    %25 = arith.subf %21, %24 : vector<16x16xf32>
    %26 = math.exp %25 : vector<16x16xf32>
    %cst_7 = arith.constant dense<0.000000e+00> : vector<16xf32>
    %27 = vector.multi_reduction <add>, %26, %cst_7 [1] : vector<16x16xf32> to vector<16xf32>
    %28 = vector.shape_cast %27 : vector<16xf32> to vector<16x1xf32>
    %29 = tpu.reciprocal %28 {approx = true} : vector<16x1xf32> -> vector<16x1xf32>
    %30 = vector.broadcast %29 : vector<16x1xf32> to vector<16x16xf32>
    %31 = arith.mulf %26, %30 : vector<16x16xf32>
    %32 = arith.truncf %31 : vector<16x16xf32> to vector<16x16xbf16>
    %cst_8 = arith.constant dense<0.000000e+00> : vector<16x8xf32>
    %33 = tpu.matmul %32, %20, %cst_8 {dimension_numbers = #tpu.dot_dimension_numbers<[1], [0], [0], [1], [0, 0, 1, 1], [], []>} : vector<16x16xbf16>, vector<16x8xbf16>, vector<16x8xf32> -> vector<16x8xf32>
    %34 = vector.extract_strided_slice %1 {offsets = [0, 16], sizes = [16, 8], strides = [1, 1]} : vector<16x96xbf16> to vector<16x8xbf16>
    %35 = vector.extract_strided_slice %1 {offsets = [0, 48], sizes = [16, 8], strides = [1, 1]} : vector<16x96xbf16> to vector<16x8xbf16>
    %36 = vector.extract_strided_slice %1 {offsets = [0, 80], sizes = [16, 8], strides = [1, 1]} : vector<16x96xbf16> to vector<16x8xbf16>
    %cst_9 = arith.constant dense<0.000000e+00> : vector<16x16xf32>
    %37 = tpu.matmul %34, %35, %cst_9 {dimension_numbers = #tpu.dot_dimension_numbers<[1], [1], [0], [0], [0, 0, 1, 0], [], []>} : vector<16x8xbf16>, vector<16x8xbf16>, vector<16x16xf32> -> vector<16x16xf32>
    %cst_10 = arith.constant dense<0xFF800000> : vector<16xf32>
    %38 = vector.multi_reduction <maximumf>, %37, %cst_10 [1] : vector<16x16xf32> to vector<16xf32>
    %39 = vector.shape_cast %38 : vector<16xf32> to vector<16x1xf32>
    %40 = vector.broadcast %39 : vector<16x1xf32> to vector<16x16xf32>
    %41 = arith.subf %37, %40 : vector<16x16xf32>
    %42 = math.exp %41 : vector<16x16xf32>
    %cst_11 = arith.constant dense<0.000000e+00> : vector<16xf32>
    %43 = vector.multi_reduction <add>, %42, %cst_11 [1] : vector<16x16xf32> to vector<16xf32>
    %44 = vector.shape_cast %43 : vector<16xf32> to vector<16x1xf32>
    %45 = tpu.reciprocal %44 {approx = true} : vector<16x1xf32> -> vector<16x1xf32>
    %46 = vector.broadcast %45 : vector<16x1xf32> to vector<16x16xf32>
    %47 = arith.mulf %42, %46 : vector<16x16xf32>
    %48 = arith.truncf %47 : vector<16x16xf32> to vector<16x16xbf16>
    %cst_12 = arith.constant dense<0.000000e+00> : vector<16x8xf32>
    %49 = tpu.matmul %48, %36, %cst_12 {dimension_numbers = #tpu.dot_dimension_numbers<[1], [0], [0], [1], [0, 0, 1, 1], [], []>} : vector<16x16xbf16>, vector<16x8xbf16>, vector<16x8xf32> -> vector<16x8xf32>
    %50 = vector.extract_strided_slice %1 {offsets = [0, 24], sizes = [16, 8], strides = [1, 1]} : vector<16x96xbf16> to vector<16x8xbf16>
    %51 = vector.extract_strided_slice %1 {offsets = [0, 56], sizes = [16, 8], strides = [1, 1]} : vector<16x96xbf16> to vector<16x8xbf16>
    %52 = vector.extract_strided_slice %1 {offsets = [0, 88], sizes = [16, 8], strides = [1, 1]} : vector<16x96xbf16> to vector<16x8xbf16>
    %cst_13 = arith.constant dense<0.000000e+00> : vector<16x16xf32>
    %53 = tpu.matmul %50, %51, %cst_13 {dimension_numbers = #tpu.dot_dimension_numbers<[1], [1], [0], [0], [0, 0, 1, 0], [], []>} : vector<16x8xbf16>, vector<16x8xbf16>, vector<16x16xf32> -> vector<16x16xf32>
    %cst_14 = arith.constant dense<0xFF800000> : vector<16xf32>
    %54 = vector.multi_reduction <maximumf>, %53, %cst_14 [1] : vector<16x16xf32> to vector<16xf32>
    %55 = vector.shape_cast %54 : vector<16xf32> to vector<16x1xf32>
    %56 = vector.broadcast %55 : vector<16x1xf32> to vector<16x16xf32>
    %57 = arith.subf %53, %56 : vector<16x16xf32>
    %58 = math.exp %57 : vector<16x16xf32>
    %cst_15 = arith.constant dense<0.000000e+00> : vector<16xf32>
    %59 = vector.multi_reduction <add>, %58, %cst_15 [1] : vector<16x16xf32> to vector<16xf32>
    %60 = vector.shape_cast %59 : vector<16xf32> to vector<16x1xf32>
    %61 = tpu.reciprocal %60 {approx = true} : vector<16x1xf32> -> vector<16x1xf32>
    %62 = vector.broadcast %61 : vector<16x1xf32> to vector<16x16xf32>
    %63 = arith.mulf %58, %62 : vector<16x16xf32>
    %64 = arith.truncf %63 : vector<16x16xf32> to vector<16x16xbf16>
    %cst_16 = arith.constant dense<0.000000e+00> : vector<16x8xf32>
    %65 = tpu.matmul %64, %52, %cst_16 {dimension_numbers = #tpu.dot_dimension_numbers<[1], [0], [0], [1], [0, 0, 1, 1], [], []>} : vector<16x16xbf16>, vector<16x8xbf16>, vector<16x8xf32> -> vector<16x8xf32>
    %66 = tpu.concatenate %17, %33, %49, %65 in 1 : vector<16x8xf32>, vector<16x8xf32>, vector<16x8xf32>, vector<16x8xf32> -> vector<16x32xf32>
    %67 = arith.truncf %66 : vector<16x32xf32> to vector<16x32xbf16>
    %c0_17 = arith.constant 0 : index
    %c0_18 = arith.constant 0 : index
    %c0_19 = arith.constant 0 : index
    %68 = vector.load %arg2[%c0_17, %c0_18, %c0_19] : memref<1x16x32xbf16, #tpu.memory_space<vmem>>, vector<1x16x32xbf16>
    %69 = vector.shape_cast %68 : vector<1x16x32xbf16> to vector<16x32xbf16>
    %70 = vector.shape_cast %67 : vector<16x32xbf16> to vector<1x16x32xbf16>
    tpu.vector_store %arg2[%c0_17, %c0_18, %c0_19], %70 {strides = array<i32>} : memref<1x16x32xbf16, #tpu.memory_space<vmem>>, vector<1x16x32xbf16>,
    return
  }
  func.func @transform_0(%arg0: i32) -> (i32, i32, i32) {
    %c0_i32 = arith.constant 0 : i32
    %c0_i32_0 = arith.constant 0 : i32
    %c0_i32_1 = arith.constant 0 : i32
    return %arg0, %c0_i32, %c0_i32_0 : i32, i32, i32
  }
  func.func @transform_1(%arg0: i32) -> (i32, i32, i32) {
    %c0_i32 = arith.constant 0 : i32
    %c0_i32_0 = arith.constant 0 : i32
    %c0_i32_1 = arith.constant 0 : i32
    return %arg0, %c0_i32, %c0_i32_0 : i32, i32, i32
  }
}

module attributes {stable_mosaic.version = 11 : i64} {
  func.func @_matmul_bias_res_ln_kernel(%arg0: i32, %arg1: memref<16x32xbf16, #tpu.memory_space<vmem>>, %arg2: memref<32x32xbf16, #tpu.memory_space<vmem>>, %arg3: memref<1x32xf32, #tpu.memory_space<vmem>>, %arg4: memref<16x32xbf16, #tpu.memory_space<vmem>>, %arg5: memref<1x32xf32, #tpu.memory_space<vmem>>, %arg6: memref<1x32xf32, #tpu.memory_space<vmem>>, %arg7: memref<16x32xbf16, #tpu.memory_space<vmem>>) attributes {dimension_semantics = [#tpu.dimension_semantics<parallel>], iteration_bounds = array<i64: 2>, scalar_prefetch = 0 : i64, scratch_operands = 0 : i64, tpu.core_type = #tpu.core_type<tc>, window_params = [{transform_indices = @transform_0, window_bounds = array<i64: 16, 32>}, {pipeline_mode = #tpu.pipeline_mode<synchronous>, transform_indices = @transform_1, window_bounds = array<i64: 32, 32>}, {pipeline_mode = #tpu.pipeline_mode<synchronous>, transform_indices = @transform_2, window_bounds = array<i64: 1, 32>}, {transform_indices = @transform_3, window_bounds = array<i64: 16, 32>}, {pipeline_mode = #tpu.pipeline_mode<synchronous>, transform_indices = @transform_4, window_bounds = array<i64: 1, 32>}, {pipeline_mode = #tpu.pipeline_mode<synchronous>, transform_indices = @transform_5, window_bounds = array<i64: 1, 32>}, {transform_indices = @transform_6, window_bounds = array<i64: 16, 32>}]} {
    %c0 = arith.constant 0 : index
    %c0_0 = arith.constant 0 : index
    %0 = vector.load %arg1[%c0, %c0_0] : memref<16x32xbf16, #tpu.memory_space<vmem>>, vector<16x32xbf16>
    %c0_1 = arith.constant 0 : index
    %c0_2 = arith.constant 0 : index
    %1 = vector.load %arg2[%c0_1, %c0_2] : memref<32x32xbf16, #tpu.memory_space<vmem>>, vector<32x32xbf16>
    %cst = arith.constant dense<0.000000e+00> : vector<16x32xf32>
    %2 = tpu.matmul %0, %1, %cst {dimension_numbers = #tpu.dot_dimension_numbers<[1], [0], [0], [1], [0, 0, 1, 1], [], []>} : vector<16x32xbf16>, vector<32x32xbf16>, vector<16x32xf32> -> vector<16x32xf32>
    %c0_3 = arith.constant 0 : index
    %c0_4 = arith.constant 0 : index
    %3 = vector.load %arg3[%c0_3, %c0_4] : memref<1x32xf32, #tpu.memory_space<vmem>>, vector<1x32xf32>
    %4 = vector.broadcast %3 : vector<1x32xf32> to vector<16x32xf32>
    %5 = arith.addf %2, %4 : vector<16x32xf32>
    %c0_5 = arith.constant 0 : index
    %c0_6 = arith.constant 0 : index
    %6 = vector.load %arg4[%c0_5, %c0_6] : memref<16x32xbf16, #tpu.memory_space<vmem>>, vector<16x32xbf16>
    %7 = arith.extf %6 : vector<16x32xbf16> to vector<16x32xf32>
    %8 = arith.addf %5, %7 : vector<16x32xf32>
    %cst_7 = arith.constant dense<0.000000e+00> : vector<16xf32>
    %9 = vector.multi_reduction <add>, %8, %cst_7 [1] : vector<16x32xf32> to vector<16xf32>
    %10 = vector.shape_cast %9 : vector<16xf32> to vector<16x1xf32>
    %cst_8 = arith.constant 3.200000e+01 : f32
    %11 = vector.broadcast %cst_8 : f32 to vector<16x1xf32>
    %12 = arith.divf %10, %11 : vector<16x1xf32>
    %13 = vector.broadcast %12 : vector<16x1xf32> to vector<16x32xf32>
    %14 = arith.subf %8, %13 : vector<16x32xf32>
    %15 = vector.broadcast %12 : vector<16x1xf32> to vector<16x32xf32>
    %16 = arith.subf %8, %15 : vector<16x32xf32>
    %17 = arith.mulf %14, %16 : vector<16x32xf32>
    %cst_9 = arith.constant dense<0.000000e+00> : vector<16xf32>
    %18 = vector.multi_reduction <add>, %17, %cst_9 [1] : vector<16x32xf32> to vector<16xf32>
    %19 = vector.shape_cast %18 : vector<16xf32> to vector<16x1xf32>
    %cst_10 = arith.constant 3.200000e+01 : f32
    %20 = vector.broadcast %cst_10 : f32 to vector<16x1xf32>
    %21 = arith.divf %19, %20 : vector<16x1xf32>
    %cst_11 = arith.constant 9.99999996E-13 : f32
    %22 = vector.broadcast %cst_11 : f32 to vector<16x1xf32>
    %23 = arith.addf %21, %22 : vector<16x1xf32>
    %24 = math.rsqrt %23 : vector<16x1xf32>
    %25 = vector.broadcast %12 : vector<16x1xf32> to vector<16x32xf32>
    %26 = arith.subf %8, %25 : vector<16x32xf32>
    %27 = vector.broadcast %24 : vector<16x1xf32> to vector<16x32xf32>
    %28 = arith.mulf %26, %27 : vector<16x32xf32>
    %c0_12 = arith.constant 0 : index
    %c0_13 = arith.constant 0 : index
    %29 = vector.load %arg5[%c0_12, %c0_13] : memref<1x32xf32, #tpu.memory_space<vmem>>, vector<1x32xf32>
    %30 = vector.broadcast %29 : vector<1x32xf32> to vector<16x32xf32>
    %31 = arith.mulf %28, %30 : vector<16x32xf32>
    %c0_14 = arith.constant 0 : index
    %c0_15 = arith.constant 0 : index
    %32 = vector.load %arg6[%c0_14, %c0_15] : memref<1x32xf32, #tpu.memory_space<vmem>>, vector<1x32xf32>
    %33 = vector.broadcast %32 : vector<1x32xf32> to vector<16x32xf32>
    %34 = arith.addf %31, %33 : vector<16x32xf32>
    %35 = arith.truncf %34 : vector<16x32xf32> to vector<16x32xbf16>
    %c0_16 = arith.constant 0 : index
    %c0_17 = arith.constant 0 : index
    %36 = vector.load %arg7[%c0_16, %c0_17] : memref<16x32xbf16, #tpu.memory_space<vmem>>, vector<16x32xbf16>
    tpu.vector_store %arg7[%c0_16, %c0_17], %35 {strides = array<i32>} : memref<16x32xbf16, #tpu.memory_space<vmem>>, vector<16x32xbf16>,
    return
  }
  func.func @transform_0(%arg0: i32) -> (i32, i32) {
    %c0_i32 = arith.constant 0 : i32
    %c0_i32_0 = arith.constant 0 : i32
    return %arg0, %c0_i32 : i32, i32
  }
  func.func @transform_1(%arg0: i32) -> (i32, i32) {
    %c0_i32 = arith.constant 0 : i32
    %c0_i32_0 = arith.constant 0 : i32
    %c0_i32_1 = arith.constant 0 : i32
    return %c0_i32, %c0_i32_0 : i32, i32
  }
  func.func @transform_2(%arg0: i32) -> (i32, i32) {
    %c0_i32 = arith.constant 0 : i32
    %c0_i32_0 = arith.constant 0 : i32
    %c0_i32_1 = arith.constant 0 : i32
    return %c0_i32, %c0_i32_0 : i32, i32
  }
  func.func @transform_3(%arg0: i32) -> (i32, i32) {
    %c0_i32 = arith.constant 0 : i32
    %c0_i32_0 = arith.constant 0 : i32
    return %arg0, %c0_i32 : i32, i32
  }
  func.func @transform_4(%arg0: i32) -> (i32, i32) {
    %c0_i32 = arith.constant 0 : i32
    %c0_i32_0 = arith.constant 0 : i32
    %c0_i32_1 = arith.constant 0 : i32
    return %c0_i32, %c0_i32_0 : i32, i32
  }
  func.func @transform_5(%arg0: i32) -> (i32, i32) {
    %c0_i32 = arith.constant 0 : i32
    %c0_i32_0 = arith.constant 0 : i32
    %c0_i32_1 = arith.constant 0 : i32
    return %c0_i32, %c0_i32_0 : i32, i32
  }
  func.func @transform_6(%arg0: i32) -> (i32, i32) {
    %c0_i32 = arith.constant 0 : i32
    %c0_i32_0 = arith.constant 0 : i32
    return %arg0, %c0_i32 : i32, i32
  }
}

module attributes {stable_mosaic.version = 11 : i64} {
  func.func @_matmul_bias_kernel(%arg0: i32, %arg1: memref<16x32xbf16, #tpu.memory_space<vmem>>, %arg2: memref<32x64xbf16, #tpu.memory_space<vmem>>, %arg3: memref<1x64xf32, #tpu.memory_space<vmem>>, %arg4: memref<16x64xbf16, #tpu.memory_space<vmem>>) attributes {dimension_semantics = [#tpu.dimension_semantics<parallel>], iteration_bounds = array<i64: 2>, scalar_prefetch = 0 : i64, scratch_operands = 0 : i64, tpu.core_type = #tpu.core_type<tc>, window_params = [{transform_indices = @transform_0, window_bounds = array<i64: 16, 32>}, {pipeline_mode = #tpu.pipeline_mode<synchronous>, transform_indices = @transform_1, window_bounds = array<i64: 32, 64>}, {pipeline_mode = #tpu.pipeline_mode<synchronous>, transform_indices = @transform_2, window_bounds = array<i64: 1, 64>}, {transform_indices = @transform_3, window_bounds = array<i64: 16, 64>}]} {
    %c0 = arith.constant 0 : index
    %c0_0 = arith.constant 0 : index
    %0 = vector.load %arg1[%c0, %c0_0] : memref<16x32xbf16, #tpu.memory_space<vmem>>, vector<16x32xbf16>
    %c0_1 = arith.constant 0 : index
    %c0_2 = arith.constant 0 : index
    %1 = vector.load %arg2[%c0_1, %c0_2] : memref<32x64xbf16, #tpu.memory_space<vmem>>, vector<32x64xbf16>
    %cst = arith.constant dense<0.000000e+00> : vector<16x64xf32>
    %2 = tpu.matmul %0, %1, %cst {dimension_numbers = #tpu.dot_dimension_numbers<[1], [0], [0], [1], [0, 0, 1, 1], [], []>} : vector<16x32xbf16>, vector<32x64xbf16>, vector<16x64xf32> -> vector<16x64xf32>
    %c0_3 = arith.constant 0 : index
    %c0_4 = arith.constant 0 : index
    %3 = vector.load %arg3[%c0_3, %c0_4] : memref<1x64xf32, #tpu.memory_space<vmem>>, vector<1x64xf32>
    %4 = vector.broadcast %3 : vector<1x64xf32> to vector<16x64xf32>
    %5 = arith.addf %2, %4 : vector<16x64xf32>
    %cst_5 = arith.constant 5.000000e-01 : f32
    %6 = vector.broadcast %cst_5 : f32 to vector<16x64xf32>
    %7 = arith.mulf %6, %5 : vector<16x64xf32>
    %cst_6 = arith.constant 0.707106769 : f32
    %8 = vector.broadcast %cst_6 : f32 to vector<16x64xf32>
    %9 = arith.mulf %5, %8 : vector<16x64xf32>
    %10 = math.erf %9 : vector<16x64xf32>
    %cst_7 = arith.constant 1.000000e+00 : f32
    %11 = vector.broadcast %cst_7 : f32 to vector<16x64xf32>
    %12 = arith.addf %11, %10 : vector<16x64xf32>
    %13 = arith.mulf %7, %12 : vector<16x64xf32>
    %14 = arith.truncf %13 : vector<16x64xf32> to vector<16x64xbf16>
    %c0_8 = arith.constant 0 : index
    %c0_9 = arith.constant 0 : index
    %15 = vector.load %arg4[%c0_8, %c0_9] : memref<16x64xbf16, #tpu.memory_space<vmem>>, vector<16x64xbf16>
    tpu.vector_store %arg4[%c0_8, %c0_9], %14 {strides = array<i32>} : memref<16x64xbf16, #tpu.memory_space<vmem>>, vector<16x64xbf16>,
    return
  }
  func.func @transform_0(%arg0: i32) -> (i32, i32) {
    %c0_i32 = arith.constant 0 : i32
    %c0_i32_0 = arith.constant 0 : i32
    return %arg0, %c0_i32 : i32, i32
  }
  func.func @transform_1(%arg0: i32) -> (i32, i32) {
    %c0_i32 = arith.constant 0 : i32
    %c0_i32_0 = arith.constant 0 : i32
    %c0_i32_1 = arith.constant 0 : i32
    return %c0_i32, %c0_i32_0 : i32, i32
  }
  func.func @transform_2(%arg0: i32) -> (i32, i32) {
    %c0_i32 = arith.constant 0 : i32
    %c0_i32_0 = arith.constant 0 : i32
    %c0_i32_1 = arith.constant 0 : i32
    return %c0_i32, %c0_i32_0 : i32, i32
  }
  func.func @transform_3(%arg0: i32) -> (i32, i32) {
    %c0_i32 = arith.constant 0 : i32
    %c0_i32_0 = arith.constant 0 : i32
    return %arg0, %c0_i32 : i32, i32
  }
}

module attributes {stable_mosaic.version = 11 : i64} {
  func.func @_matmul_bias_res_ln_kernel(%arg0: i32, %arg1: memref<16x64xbf16, #tpu.memory_space<vmem>>, %arg2: memref<64x32xbf16, #tpu.memory_space<vmem>>, %arg3: memref<1x32xf32, #tpu.memory_space<vmem>>, %arg4: memref<16x32xbf16, #tpu.memory_space<vmem>>, %arg5: memref<1x32xf32, #tpu.memory_space<vmem>>, %arg6: memref<1x32xf32, #tpu.memory_space<vmem>>, %arg7: memref<16x32xbf16, #tpu.memory_space<vmem>>) attributes {dimension_semantics = [#tpu.dimension_semantics<parallel>], iteration_bounds = array<i64: 2>, scalar_prefetch = 0 : i64, scratch_operands = 0 : i64, tpu.core_type = #tpu.core_type<tc>, window_params = [{transform_indices = @transform_0, window_bounds = array<i64: 16, 64>}, {pipeline_mode = #tpu.pipeline_mode<synchronous>, transform_indices = @transform_1, window_bounds = array<i64: 64, 32>}, {pipeline_mode = #tpu.pipeline_mode<synchronous>, transform_indices = @transform_2, window_bounds = array<i64: 1, 32>}, {transform_indices = @transform_3, window_bounds = array<i64: 16, 32>}, {pipeline_mode = #tpu.pipeline_mode<synchronous>, transform_indices = @transform_4, window_bounds = array<i64: 1, 32>}, {pipeline_mode = #tpu.pipeline_mode<synchronous>, transform_indices = @transform_5, window_bounds = array<i64: 1, 32>}, {transform_indices = @transform_6, window_bounds = array<i64: 16, 32>}]} {
    %c0 = arith.constant 0 : index
    %c0_0 = arith.constant 0 : index
    %0 = vector.load %arg1[%c0, %c0_0] : memref<16x64xbf16, #tpu.memory_space<vmem>>, vector<16x64xbf16>
    %c0_1 = arith.constant 0 : index
    %c0_2 = arith.constant 0 : index
    %1 = vector.load %arg2[%c0_1, %c0_2] : memref<64x32xbf16, #tpu.memory_space<vmem>>, vector<64x32xbf16>
    %cst = arith.constant dense<0.000000e+00> : vector<16x32xf32>
    %2 = tpu.matmul %0, %1, %cst {dimension_numbers = #tpu.dot_dimension_numbers<[1], [0], [0], [1], [0, 0, 1, 1], [], []>} : vector<16x64xbf16>, vector<64x32xbf16>, vector<16x32xf32> -> vector<16x32xf32>
    %c0_3 = arith.constant 0 : index
    %c0_4 = arith.constant 0 : index
    %3 = vector.load %arg3[%c0_3, %c0_4] : memref<1x32xf32, #tpu.memory_space<vmem>>, vector<1x32xf32>
    %4 = vector.broadcast %3 : vector<1x32xf32> to vector<16x32xf32>
    %5 = arith.addf %2, %4 : vector<16x32xf32>
    %c0_5 = arith.constant 0 : index
    %c0_6 = arith.constant 0 : index
    %6 = vector.load %arg4[%c0_5, %c0_6] : memref<16x32xbf16, #tpu.memory_space<vmem>>, vector<16x32xbf16>
    %7 = arith.extf %6 : vector<16x32xbf16> to vector<16x32xf32>
    %8 = arith.addf %5, %7 : vector<16x32xf32>
    %cst_7 = arith.constant dense<0.000000e+00> : vector<16xf32>
    %9 = vector.multi_reduction <add>, %8, %cst_7 [1] : vector<16x32xf32> to vector<16xf32>
    %10 = vector.shape_cast %9 : vector<16xf32> to vector<16x1xf32>
    %cst_8 = arith.constant 3.200000e+01 : f32
    %11 = vector.broadcast %cst_8 : f32 to vector<16x1xf32>
    %12 = arith.divf %10, %11 : vector<16x1xf32>
    %13 = vector.broadcast %12 : vector<16x1xf32> to vector<16x32xf32>
    %14 = arith.subf %8, %13 : vector<16x32xf32>
    %15 = vector.broadcast %12 : vector<16x1xf32> to vector<16x32xf32>
    %16 = arith.subf %8, %15 : vector<16x32xf32>
    %17 = arith.mulf %14, %16 : vector<16x32xf32>
    %cst_9 = arith.constant dense<0.000000e+00> : vector<16xf32>
    %18 = vector.multi_reduction <add>, %17, %cst_9 [1] : vector<16x32xf32> to vector<16xf32>
    %19 = vector.shape_cast %18 : vector<16xf32> to vector<16x1xf32>
    %cst_10 = arith.constant 3.200000e+01 : f32
    %20 = vector.broadcast %cst_10 : f32 to vector<16x1xf32>
    %21 = arith.divf %19, %20 : vector<16x1xf32>
    %cst_11 = arith.constant 9.99999996E-13 : f32
    %22 = vector.broadcast %cst_11 : f32 to vector<16x1xf32>
    %23 = arith.addf %21, %22 : vector<16x1xf32>
    %24 = math.rsqrt %23 : vector<16x1xf32>
    %25 = vector.broadcast %12 : vector<16x1xf32> to vector<16x32xf32>
    %26 = arith.subf %8, %25 : vector<16x32xf32>
    %27 = vector.broadcast %24 : vector<16x1xf32> to vector<16x32xf32>
    %28 = arith.mulf %26, %27 : vector<16x32xf32>
    %c0_12 = arith.constant 0 : index
    %c0_13 = arith.constant 0 : index
    %29 = vector.load %arg5[%c0_12, %c0_13] : memref<1x32xf32, #tpu.memory_space<vmem>>, vector<1x32xf32>
    %30 = vector.broadcast %29 : vector<1x32xf32> to vector<16x32xf32>
    %31 = arith.mulf %28, %30 : vector<16x32xf32>
    %c0_14 = arith.constant 0 : index
    %c0_15 = arith.constant 0 : index
    %32 = vector.load %arg6[%c0_14, %c0_15] : memref<1x32xf32, #tpu.memory_space<vmem>>, vector<1x32xf32>
    %33 = vector.broadcast %32 : vector<1x32xf32> to vector<16x32xf32>
    %34 = arith.addf %31, %33 : vector<16x32xf32>
    %35 = arith.truncf %34 : vector<16x32xf32> to vector<16x32xbf16>
    %c0_16 = arith.constant 0 : index
    %c0_17 = arith.constant 0 : index
    %36 = vector.load %arg7[%c0_16, %c0_17] : memref<16x32xbf16, #tpu.memory_space<vmem>>, vector<16x32xbf16>
    tpu.vector_store %arg7[%c0_16, %c0_17], %35 {strides = array<i32>} : memref<16x32xbf16, #tpu.memory_space<vmem>>, vector<16x32xbf16>,
    return
  }
  func.func @transform_0(%arg0: i32) -> (i32, i32) {
    %c0_i32 = arith.constant 0 : i32
    %c0_i32_0 = arith.constant 0 : i32
    return %arg0, %c0_i32 : i32, i32
  }
  func.func @transform_1(%arg0: i32) -> (i32, i32) {
    %c0_i32 = arith.constant 0 : i32
    %c0_i32_0 = arith.constant 0 : i32
    %c0_i32_1 = arith.constant 0 : i32
    return %c0_i32, %c0_i32_0 : i32, i32
  }
  func.func @transform_2(%arg0: i32) -> (i32, i32) {
    %c0_i32 = arith.constant 0 : i32
    %c0_i32_0 = arith.constant 0 : i32
    %c0_i32_1 = arith.constant 0 : i32
    return %c0_i32, %c0_i32_0 : i32, i32
  }
  func.func @transform_3(%arg0: i32) -> (i32, i32) {
    %c0_i32 = arith.constant 0 : i32
    %c0_i32_0 = arith.constant 0 : i32
    return %arg0, %c0_i32 : i32, i32
  }
  func.func @transform_4(%arg0: i32) -> (i32, i32) {
    %c0_i32 = arith.constant 0 : i32
    %c0_i32_0 = arith.constant 0 : i32
    %c0_i32_1 = arith.constant 0 : i32
    return %c0_i32, %c0_i32_0 : i32, i32
  }
  func.func @transform_5(%arg0: i32) -> (i32, i32) {
    %c0_i32 = arith.constant 0 : i32
    %c0_i32_0 = arith.constant 0 : i32
    %c0_i32_1 = arith.constant 0 : i32
    return %c0_i32, %c0_i32_0 : i32, i32
  }
  func.func @transform_6(%arg0: i32) -> (i32, i32) {
    %c0_i32 = arith.constant 0 : i32
    %c0_i32_0 = arith.constant 0 : i32
    return %arg0, %c0_i32 : i32, i32
  }
}

</mosaic_0001>

<bundles_post_ra>
// kernel: frozen_bert_forward.11
= control target key start
LH: loop header
LB: loop body
LE: loop exit
PB: predicated region body
PF: predicated region fallthrough
CT: control target
= control target key end

     0   :  { %s346_s12 = smov 0   ;;  %s377_s0 = inlined_call_operand.vmem [shape: f32[32,32], index: 0, kind: input, shape index: {}]   ;;  %s378_s1 = inlined_call_operand.vmem [shape: f32[1,32], index: 1, kind: input, shape index: {}]   ;;  %s379_s2 = inlined_call_operand.vmem [shape: f32[1,32], index: 2, kind: input, shape index: {}]   ;;  %s380_s3 = inlined_call_operand.vmem [shape: bf16[32,32], index: 3, kind: output, shape index: {}]  }
   0x1 LB: > { %s289_s13 = sadd.s32 4294967295, %s324_s12   ;;  %p293_p0 = scmp.ge.s32.totalorder %s324_s12, 1  ;;  %s324_s12 = sphi %s346_s12, %s13_s12  }
   0x2   : > { %p138_p1 = scmp.lt.s32.totalorder %s324_s12, 3 }
   0x4   : > { %p139_p2 = pnand %p293_p0, %p138_p1 }
   0x5   : > { %s294_s14 = sshll.u32 (!%p139_p2), %s289_s13, 1  ;;  %vm176_vm0 = vcmask (!%p139_p2), 261120   ;;  %v298_v21 = vld [vmem:[%s378_s1] ss:$0 sm:$0xff] (!%p139_p2)  ;;  %vm230_vm1 = vcmask (!%p139_p2), 257024  }
   0x6   : > { %142 = sbr.rel (%p139_p2) target bundleno = 337 (0x151), region = 32  ;;  %p163_p3 = scmp.lt.s32.totalorder (!%p139_p2), %s294_s14, 3  ;;  %v299_v23 = vld [vmem:[%s379_s2] ss:$0 sm:$0xff] (!%p139_p2) }
   0xd   : > { %s382_s14 = smov (!%p163_p3, %s294_s14), 3 }
   0xe   : > { %s295_s15 = sshll.u32 %s382_s14, 3  ;;  %s297_s23 = sshll.u32 %s382_s14, 2 }
   0xf   : > { %s166_s18 = scalar_lea.vmem %s377_s0, %s295_s15  ;;  %s172_s26 = scalar_lea.vmem %s380_s3, %s297_s23 }
  0x10   : > { %v174_v0 = vld [vmem:[%s166_s18] sm:$0xff]  ;;  %v175_v1 = vld [vmem:[%s166_s18 + $0x8] sm:$0xff] }
  0x11   : > { %v177_v2 = vsel %vm176_vm0, %v174_v0, 0.0  ;;  %v180_v3 = vsel %vm176_vm0, %v175_v1, 0.0 }
  0x12   : > { %178 = vadd.xlane.f32.xlu0 %v177_v2 }
  0x16   : > { %181 = vadd.xlane.f32.xlu0 %v180_v3 }
  0x9f   : > { %v179_v4 = vpop.xlane.xlu0 %178 }
  0xa0   : > { %v184_v5 = vmul.f32 0.03125, %v179_v4 }
  0xa2   : > { %v186_v6 = vsub.f32 %v174_v0, %v184_v5 }
  0xa3   : > { %v182_v7 = vpop.xlane.xlu0 %181 }
  0xa4   : > { %v185_v8 = vmul.f32 0.03125, %v182_v7  ;;  %v188_v9 = vmul.f32 %v186_v6, %v186_v6 }
  0xa6   : > { %v187_v10 = vsub.f32 %v175_v1, %v185_v8  ;;  %v190_v11 = vsel %vm176_vm0, %v188_v9, 0.0 }
  0xa7   : > { %191 = vadd.xlane.f32.xlu1 %v190_v11 }
  0xa8   : > { %v189_v12 = vmul.f32 %v187_v10, %v187_v10 }
  0xaa   : > { %v193_v13 = vsel %vm176_vm0, %v189_v12, 0.0 }
  0xab   : > { %194 = vadd.xlane.f32.xlu1 %v193_v13 }
 0x134   : > { %v192_v14 = vpop.xlane.xlu1 %191 }
 0x135   : > { %v196_v15 = vmul.f32 0.03125, %v192_v14 }
 0x137   : > { %v198_v16 = vadd.f32 1e-12, %v196_v15 }
 0x138   : > { %v195_v17 = vpop.xlane.xlu1 %194 }
 0x139   : > { %314 = vrsqrt.f32 %v198_v16  ;;  %v197_v18 = vmul.f32 0.03125, %v195_v17 }
 0x13b   : > { %v199_v19 = vadd.f32 1e-12, %v197_v18 }
 0x13d   : > { %316 = vrsqrt.f32 %v199_v19 }
 0x143   : > { %v315_v20 = vpop.eup %314 }
 0x144   : > { %v202_v22 = vmul.f32 %v315_v20, %v186_v6 }
 0x146   : > { %v211_v24 = vmul.f32 %v298_v21, %v202_v22 }
 0x147   : > { %v317_v25 = vpop.eup %316 }
 0x148   : > { %v220_v26 = vadd.f32 %v299_v23, %v211_v24  ;;  %v203_v27 = vmul.f32 %v317_v25, %v187_v10 }
 0x14a   : > { %v304_v28 = vpack.c.bf16 %v220_v26, %v220_v26  ;;  %v212_v29 = vmul.f32 %v298_v21, %v203_v27 }
 0x14c   : > { %231 = vst.msk [vmem:[%s172_s26] sm:$0xf] %vm230_vm1, %v304_v28  ;;  %v221_v30 = vadd.f32 %v299_v23, %v212_v29 }
 0x14e   : > { %v305_v31 = vpack.c.bf16 %v221_v30, %v221_v30 }
 0x150   : > { %232 = vst.msk [vmem:[%s172_s26 + $0x4] sm:$0xf] %vm230_vm1, %v305_v31 }
 0x151 PF: > { %s13_s12 = sadd.s32 1, %s324_s12  }
 0x152   : > { %p10_p4 = scmp.ge.s32.totalorder %s13_s12, 4  }
 0x154   :  { %12 = sbr.rel (!%p10_p4) target bundleno = 1 (0x1), region = 62 }

// kernel: frozen_bert_forward.12
= control target key start
LH: loop header
LB: loop body
LE: loop exit
PB: predicated region body
PF: predicated region fallthrough
CT: control target
= control target key end

     0   :  { %s391_s12 = smov 0   ;;  %s417_s0 = inlined_call_operand.vmem [shape: bf16[32,32], index: 0, kind: input, shape index: {}]   ;;  %s418_s1 = inlined_call_operand.vmem [shape: bf16[32,96], index: 1, kind: input, shape index: {}]   ;;  %s419_s2 = inlined_call_operand.vmem [shape: f32[1,96], index: 2, kind: input, shape index: {}]   ;;  %s420_s3 = inlined_call_operand.vmem [shape: bf16[32,96], index: 3, kind: output, shape index: {}]  }
   0x1 LB: > { %s317_s13 = sadd.s32 4294967295, %s367_s12   ;;  %p321_p0 = scmp.ge.s32.totalorder %s367_s12, 1  ;;  %s367_s12 = sphi %s391_s12, %s13_s12  }
   0x2   : > { %p138_p1 = scmp.lt.s32.totalorder %s367_s12, 3 }
   0x4   : > { %p139_p2 = pnand %p321_p0, %p138_p1 }
   0x5   : > { %v358_v0 = vld [vmem:[%s418_s1] sm:$0xff] (!%p139_p2)   ;;  %v369_v1 = vmov (!%p139_p2), 0.0   ;;  %v359_v2 = vld [vmem:[%s418_s1 + $0x8] sm:$0xff] (!%p139_p2)   ;;  %vm370_vm0 = vmmov (!%p139_p2), 0   ;;  %s322_s18 = sshll.u32 (!%p139_p2), %s317_s13, 1  ;;  %vm205_vm1 = vcmask (!%p139_p2), 261120  }
   0x6   : > { %142 = sbr.rel (%p139_p2) target bundleno = 236 (0xec), region = 32  ;;  %340 = vmatprep.subr.bf16.mxu0 (!%p139_p2), %v369_v1  ;;  %344 = vmatprep.mubr.msk.bf16.mxu0 (!%p139_p2), %vm370_vm0, %v369_v1  ;;  %p163_p3 = scmp.lt.s32.totalorder (!%p139_p2), %s322_s18, 3  ;;  %v326_v4 = vld [vmem:[%s419_s2] ss:$0 sm:$0xff] (!%p139_p2)  ;;  %vm258_vm2 = vcmask (!%p139_p2), 781312  }
   0x7   : > { %341 = vmatpush3.bf16.msra.mxu0 (!%p139_p2), %v358_v0 }
   0x8   : > { %342 = vmatprep.subr.bf16.mxu0 (!%p139_p2), %v369_v1 }
   0xb   : > { %343 = vmatpush3.bf16.msra.mxu0 (!%p139_p2), %v359_v2 }
   0xd   : > { %s422_s18 = smov (!%p163_p3, %s322_s18), 3 }
   0xe   : > { %s323_s19 = sshll.u32 %s422_s18, 2 }
   0xf   : > { %s166_s22 = scalar_lea.vmem %s417_s0, %s323_s19  ;;  %s172_s27 = scalar_lea.vmem %s420_s3, %s323_s19 }
  0x10   : > { %v360_v3 = vld [vmem:[%s166_s22] sm:$0xff]  }
  0x11   : > { %345 = vmatmul.mubr.msk.bf16.vlgmr.msra.gmra.mrb[0].mxu0 %vm205_vm1, %v360_v3 }
  0xe4   : > { %v243_v5 = vpop.f32.mrb[0].mxu0 }
  0xe5   : > { %v244_v6 = vadd.f32 %v326_v4, %v243_v5  ;;  %v346_v7 = vpop.f32.mrb[1].mxu0 }
  0xe6   : > { %v246_v8 = vpop.f32.mrb[2].mxu0 }
  0xe7   : > { %v335_v9 = vpack.c.bf16 %v244_v6, %v244_v6  ;;  %v247_v10 = vadd.f32 %v326_v4, %v246_v8  ;;  %v347_v11 = vpop.f32.mrb[3].mxu0 }
  0xe9   : > { %259 = vst.msk [vmem:[%s172_s27] sm:$0xf] %vm258_vm2, %v335_v9  ;;  %v336_v12 = vpack.c.bf16 %v247_v10, %v247_v10 }
  0xeb   : > { %260 = vst.msk [vmem:[%s172_s27 + $0x4] sm:$0xf] %vm258_vm2, %v336_v12 }
  0xec PF: > { %s13_s12 = sadd.s32 1, %s367_s12  }
  0xed   : > { %p10_p4 = scmp.ge.s32.totalorder %s13_s12, 4  }
  0xef   :  { %12 = sbr.rel (!%p10_p4) target bundleno = 1 (0x1), region = 62 }

// kernel: frozen_bert_forward.14
= control target key start
LH: loop header
LB: loop body
LE: loop exit
PB: predicated region body
PF: predicated region fallthrough
CT: control target
= control target key end

     0   :  { %s584_s21 = smov 0   ;;  %s629_s0 = inlined_call_operand.vmem [shape: bf16[32,32], index: 0, kind: input, shape index: {}]   ;;  %s630_s1 = inlined_call_operand.vmem [shape: bf16[32,32], index: 1, kind: input, shape index: {}]   ;;  %s631_s2 = inlined_call_operand.vmem [shape: f32[1,32], index: 2, kind: input, shape index: {}]   ;;  %s632_s3 = inlined_call_operand.vmem [shape: bf16[32,32], index: 3, kind: input, shape index: {}]   ;;  %s633_s4 = inlined_call_operand.vmem [shape: f32[1,32], index: 4, kind: input, shape index: {}]   ;;  %s634_s5 = inlined_call_operand.vmem [shape: f32[1,32], index: 5, kind: input, shape index: {}]   ;;  %s635_s6 = inlined_call_operand.vmem [shape: bf16[32,32], index: 6, kind: output, shape index: {}]  }
   0x1 LB: > { %s483_s22 = sadd.s32 4294967295, %s545_s21   ;;  %p487_p0 = scmp.ge.s32.totalorder %s545_s21, 1  ;;  %s545_s21 = sphi %s584_s21, %s16_s21  }
   0x2   : > { %p224_p1 = scmp.lt.s32.totalorder %s545_s21, 3 }
   0x4   : > { %p225_p2 = pnand %p487_p0, %p224_p1 }
   0x5   : > { %v532_v0 = vld [vmem:[%s630_s1] sm:$0xff] (!%p225_p2)   ;;  %v547_v1 = vmov (!%p225_p2), 0.0   ;;  %v533_v2 = vld [vmem:[%s630_s1 + $0x8] sm:$0xff] (!%p225_p2)   ;;  %vm548_vm0 = vmmov (!%p225_p2), 0   ;;  %s488_s27 = sshll.u32 (!%p225_p2), %s483_s22, 1  ;;  %vm308_vm1 = vcmask (!%p225_p2), 261120  }
   0x6   : > { %228 = sbr.rel (%p225_p2) target bundleno = 553 (0x229), region = 44  ;;  %514 = vmatprep.subr.bf16.mxu0 (!%p225_p2), %v547_v1  ;;  %518 = vmatprep.mubr.msk.bf16.mxu0 (!%p225_p2), %vm548_vm0, %v547_v1  ;;  %p260_p3 = scmp.lt.s32.totalorder (!%p225_p2), %s488_s27, 3  ;;  %v494_v5 = vld [vmem:[%s631_s2] ss:$0 sm:$0xff] (!%p225_p2)  ;;  %vm412_vm2 = vcmask (!%p225_p2), 257024  }
   0x7   : > { %515 = vmatpush3.bf16.msra.mxu0 (!%p225_p2), %v532_v0  ;;  %v499_v35 = vld [vmem:[%s633_s4] ss:$0 sm:$0xff] (!%p225_p2) }
   0x8   : > { %516 = vmatprep.subr.bf16.mxu0 (!%p225_p2), %v547_v1  ;;  %v500_v37 = vld [vmem:[%s634_s5] ss:$0 sm:$0xff] (!%p225_p2) }
   0xb   : > { %517 = vmatpush3.bf16.msra.mxu0 (!%p225_p2), %v533_v2 }
   0xd   : > { %s637_s27 = smov (!%p260_p3, %s488_s27), 3 }
   0xe   : > { %s598_s28 = sshll.u32 %s637_s27, 2 }
   0xf   : > { %s263_s7 = scalar_lea.vmem %s629_s0, %s598_s28  ;;  %s269_s10 = scalar_lea.vmem %s632_s3, %s598_s28 }
  0x10   : > { %v534_v3 = vld [vmem:[%s263_s7] sm:$0xff]   ;;  %s275_s19 = scalar_lea.vmem %s635_s6, %s598_s28 }
  0x11   : > { %519 = vmatmul.mubr.msk.bf16.vlgmr.msra.gmra.mrb[0].mxu0 %vm308_vm1, %v534_v3  ;;  %v508_v4 = vld [vmem:[%s269_s10] sm:$0xff]  }
  0x12   : > { %v509_v6 = vunpack.c.l.bf16 %v508_v4  ;;  %v510_v10 = vunpack.c.h.bf16 %v508_v4 }
  0xe4   : > { %v346_v7 = vpop.f32.mrb[0].mxu0 }
  0xe5   : > { %v347_v8 = vadd.f32 %v494_v5, %v346_v7  ;;  %v520_v9 = vpop.f32.mrb[1].mxu0 }
  0xe6   : > { %v349_v11 = vpop.f32.mrb[2].mxu0 }
  0xe7   : > { %v350_v12 = vadd.f32 %v494_v5, %v349_v11  ;;  %v521_v13 = vpop.f32.mrb[3].mxu0  ;;  %v357_v14 = vadd.f32 %v509_v6, %v347_v8 }
  0xe9   : > { %v359_v15 = vsel %vm308_vm1, %v357_v14, 0.0  ;;  %v358_v16 = vadd.f32 %v510_v10, %v350_v12 }
  0xea   : > { %360 = vadd.xlane.f32.xlu0 %v359_v15 }
  0xeb   : > { %v362_v17 = vsel %vm308_vm1, %v358_v16, 0.0 }
  0xee   : > { %363 = vadd.xlane.f32.xlu0 %v362_v17 }
 0x177   : > { %v361_v18 = vpop.xlane.xlu0 %360 }
 0x178   : > { %v366_v19 = vmul.f32 0.03125, %v361_v18 }
 0x17a   : > { %v368_v20 = vsub.f32 %v357_v14, %v366_v19 }
 0x17b   : > { %v364_v21 = vpop.xlane.xlu0 %363 }
 0x17c   : > { %v367_v22 = vmul.f32 0.03125, %v364_v21  ;;  %v370_v23 = vmul.f32 %v368_v20, %v368_v20 }
 0x17e   : > { %v369_v24 = vsub.f32 %v358_v16, %v367_v22  ;;  %v372_v25 = vsel %vm308_vm1, %v370_v23, 0.0 }
 0x17f   : > { %373 = vadd.xlane.f32.xlu1 %v372_v25 }
 0x180   : > { %v371_v26 = vmul.f32 %v369_v24, %v369_v24 }
 0x182   : > { %v375_v27 = vsel %vm308_vm1, %v371_v26, 0.0 }
 0x183   : > { %376 = vadd.xlane.f32.xlu1 %v375_v27 }
 0x20c   : > { %v374_v28 = vpop.xlane.xlu1 %373 }
 0x20d   : > { %v378_v29 = vmul.f32 0.03125, %v374_v28 }
 0x20f   : > { %v380_v30 = vadd.f32 1e-12, %v378_v29 }
 0x210   : > { %v377_v31 = vpop.xlane.xlu1 %376 }
 0x211   : > { %535 = vrsqrt.f32 %v380_v30  ;;  %v379_v32 = vmul.f32 0.03125, %v377_v31 }
 0x213   : > { %v381_v33 = vadd.f32 1e-12, %v379_v32 }
 0x215   : > { %537 = vrsqrt.f32 %v381_v33 }
 0x21b   : > { %v536_v34 = vpop.eup %535 }
 0x21c   : > { %v384_v36 = vmul.f32 %v536_v34, %v368_v20 }
 0x21e   : > { %v393_v38 = vmul.f32 %v499_v35, %v384_v36 }
 0x21f   : > { %v538_v39 = vpop.eup %537 }
 0x220   : > { %v402_v40 = vadd.f32 %v500_v37, %v393_v38  ;;  %v385_v41 = vmul.f32 %v538_v39, %v369_v24 }
 0x222   : > { %v505_v42 = vpack.c.bf16 %v402_v40, %v402_v40  ;;  %v394_v43 = vmul.f32 %v499_v35, %v385_v41 }
 0x224   : > { %413 = vst.msk [vmem:[%s275_s19] sm:$0xf] %vm412_vm2, %v505_v42  ;;  %v403_v44 = vadd.f32 %v500_v37, %v394_v43 }
 0x226   : > { %v506_v45 = vpack.c.bf16 %v403_v44, %v403_v44 }
 0x228   : > { %414 = vst.msk [vmem:[%s275_s19 + $0x4] sm:$0xf] %vm412_vm2, %v506_v45 }
 0x229 PF: > { %s16_s21 = sadd.s32 1, %s545_s21  }
 0x22a   : > { %p13_p4 = scmp.ge.s32.totalorder %s16_s21, 4  }
 0x22c   :  { %15 = sbr.rel (!%p13_p4) target bundleno = 1 (0x1), region = 77 }

// kernel: frozen_bert_forward.13
= control target key start
LH: loop header
LB: loop body
LE: loop exit
PB: predicated region body
PF: predicated region fallthrough
CT: control target
= control target key end

     0   :  { %s902_s6 = smov 0   ;;  %s1002_s0 = inlined_call_operand.vmem [shape: bf16[2,16,96], index: 0, kind: input, shape index: {}]   ;;  %s1003_s1 = inlined_call_operand.vmem [shape: bf16[2,16,32], index: 1, kind: output, shape index: {}]  }
   0x1 LB: > { %s706_s7 = sadd.s32 4294967295, %s874_s6   ;;  %p710_p0 = scmp.ge.s32.totalorder %s874_s6, 1  ;;  %s874_s6 = sphi %s902_s6, %s11_s6  }
   0x2   : > { %p87_p1 = scmp.lt.s32.totalorder %s874_s6, 3 }
   0x4   : > { %p88_p2 = pnand %p710_p0, %p87_p1 }
   0x5   : > { %p107_p3 = scmp.lt.s32.totalorder (!%p88_p2), %s706_s7, 1  ;;  %v876_v0 = vmov (!%p88_p2), 0.0   ;;  %vm877_vm0 = vmmov (!%p88_p2), 0   ;;  %s878_s12 = smov (!%p88_p2), 96   ;;  %vm127_vm1 = vcmask (!%p88_p2), 64512   ;;  %vm175_vm2 = vcmask (!%p88_p2), 130048  }
   0x6   : > { %91 = sbr.rel (%p88_p2) target bundleno = 1563 (0x61b), region = 24  ;;  %748 = vmatprep.subr.bf16.mxu0 (!%p88_p2), %v876_v0  ;;  %750 = vmatprep.mubr.msk.bf16.mxu0 (!%p88_p2), %vm877_vm0, %v876_v0  ;;  %s879_s13 = smov (!%p88_p2), 64   ;;  %vm637_vm3 = vcmask (!%p88_p2), 195584   ;;  %vm648_vm4 = vcmask (!%p88_p2), 257024  }
   0x7   : > { %754 = vmatprep.subr.bf16.mxu1 (!%p88_p2), %v876_v0  ;;  %756 = vmatprep.mubr.msk.bf16.mxu1 (!%p88_p2), %vm877_vm0, %v876_v0  ;;  %s880_s14 = smov (!%p88_p2), 80   ;;  %s881_s15 = smov (!%p88_p2), 88  }
   0x8   : > { %s882_s16 = smov (!%p88_p2), 120   ;;  %s883_s17 = smov (!%p88_p2), 112  }
   0x9   : > { %s884_s18 = smov (!%p88_p2), 72   ;;  %s885_s19 = smov (!%p88_p2), 104  }
   0xa   : > { %s886_s20 = smov (!%p88_p2), 56   ;;  %s887_s21 = smov (!%p88_p2), 40  }
   0xb   : > { %s888_s22 = smov (!%p88_p2), 48   ;;  %s889_s23 = smov (!%p88_p2), 8  }
   0xc   : > { %s890_s24 = smov (!%p88_p2), 16   ;;  %s891_s25 = smov (!%p88_p2), 24  }
   0xd   : > { %s1005_s7 = smov (!%p107_p3, %s706_s7), 1 }
   0xe   : > { %s728_s8 = sshll.u32 %s1005_s7, 3 }
   0xf   : > { %s111_s11 = scalar_lea.vmem %s1002_s0, %s728_s8  ;;  %s116_s28 = scalar_lea.vmem %s1003_s1, %s728_s8 }
  0x10   : > { %v924_v1 = vld [vmem:[%s111_s11] sm:$0xff]  }
  0x11   : > { %125 = vrot.lane.b32.xlu0 %v924_v1, %s878_s12 }
  0x83   : > { %v126_v2 = vpop.permute.xlu0 %125 }
  0x84   : > { %v132_v3 = vsel %vm127_vm1, %v126_v2, 0 }
  0x85   : > { %749 = vmatpush3.bf16.xpose.msra.mxu0 %v132_v3 }
  0x86   : > { %766 = vmatprep.subr.bf16.mxu0 %v876_v0 }
  0x8c   : > { %751 = vmatmul.mubr.msk.bf16.vlgmr.msra.gmra.mrb[0].mxu0 %vm127_vm1, %v924_v1 }
  0x8d   : > { %768 = vmatprep.mubr.msk.bf16.mxu0 %vm877_vm0, %v876_v0 }
 0x15f   : > { %v168_v4 = vpop.f32.mrb[0].mxu0 }
 0x160   : > { %v752_v5 = vpop.f32.mrb[1].mxu0  ;;  %v176_v6 = vsel %vm175_vm2, %v168_v4, -inf }
 0x161   : > { %177 = vmax.xlane.f32.xlu0 %v176_v6  ;;  %v171_v7 = vpop.f32.mrb[2].mxu0 }
 0x162   : > { %v753_v8 = vpop.f32.mrb[3].mxu0  ;;  %v179_v9 = vsel %vm175_vm2, %v171_v7, -inf }
 0x163   : > { %180 = vmax.xlane.f32.xlu1 %v179_v9 }
 0x174   : > { %199 = vrot.lane.b32.xlu1 %v924_v1, %s879_s13 }
 0x177   : > { %369 = vrot.lane.b32.xlu0 %v924_v1, %s880_s14 }
 0x1ee   : > { %v178_v10 = vpop.xlane.xlu0 %177 }
 0x1ef   : > { %v182_v11 = vsub.f32 %v168_v4, %v178_v10 }
 0x1f0   : > { %v181_v12 = vpop.xlane.xlu1 %180 }
 0x1f1   : > { %v184_v13 = vmul.f32 1.442695, %v182_v11  ;;  %v183_v14 = vsub.f32 %v171_v7, %v181_v12 }
 0x1f2   : > { %v370_v31 = vpop.permute.xlu0 %369 }
 0x1f3   : > { %836 = vpow2.f32 %v184_v13  ;;  %v186_v15 = vmul.f32 1.442695, %v183_v14  ;;  %v375_v33 = vsel %vm127_vm1, %v370_v31, 0 }
 0x1f4   : > { %v200_v16 = vpop.permute.xlu1 %199 }
 0x1f5   : > { %838 = vpow2.f32 %v186_v15  ;;  %755 = vmatpush3.bf16.msra.mxu1 %v200_v16 }
 0x1f6   : > { %760 = vmatprep.subr.bf16.mxu1 %v876_v0 }
 0x1fd   : > { %v837_v17 = vpop.eup %836 }
 0x1fe   : > { %v188_v18 = vsel %vm175_vm2, %v837_v17, 0.0 }
 0x1ff   : > { %v839_v19 = vpop.eup %838  ;;  %189 = vadd.xlane.f32.xlu1 %v188_v18 }
 0x200   : > { %v191_v20 = vsel %vm175_vm2, %v839_v19, 0.0 }
 0x203   : > { %192 = vadd.xlane.f32.xlu1 %v191_v20 }
 0x214   : > { %248 = vrot.lane.b32.xlu1 %v924_v1, %s881_s15 }
 0x218   : > { %246 = vrot.lane.b32.xlu1 %v924_v1, %s882_s16 }
 0x21c   : > { %367 = vrot.lane.b32.xlu1 %v924_v1, %s883_s17 }
 0x220   : > { %490 = vrot.lane.b32.xlu1 %v924_v1, %s884_s18 }
 0x224   : > { %488 = vrot.lane.b32.xlu1 %v924_v1, %s885_s19 }
 0x28c   : > { %v190_v21 = vpop.xlane.xlu1 %189 }
 0x28d   : > { %840 = vrcp.f32 %v190_v21 }
 0x290   : > { %v193_v22 = vpop.xlane.xlu1 %192 }
 0x291   : > { %842 = vrcp.f32 %v193_v22 }
 0x294   : > { %v249_v25 = vpop.permute.xlu1 %248 }
 0x295   : > { %v254_v28 = vsel %vm127_vm1, %v249_v25, 0 }
 0x297   : > { %v841_v23 = vpop.eup %840 }
 0x298   : > { %v196_v26 = vmul.f32 %v841_v23, %v837_v17  ;;  %v247_v30 = vpop.permute.xlu1 %246 }
 0x29b   : > { %v843_v24 = vpop.eup %842 }
 0x29c   : > { %v197_v27 = vmul.f32 %v843_v24, %v839_v19  ;;  %v368_v32 = vpop.permute.xlu1 %367 }
 0x29e   : > { %v198_v29 = vpack.c.bf16 %v197_v27, %v196_v26 }
 0x2a0   : > { %757 = vmatmul.mubr.msk.bf16.vlgmr.msra.gmra.mrb[0].mxu1 %vm175_vm2, %v198_v29  ;;  %v491_v34 = vpop.permute.xlu1 %490 }
 0x2a1   : > { %761 = vmatpush3.bf16.xpose.msra.mxu1 %v254_v28  ;;  %762 = vmatprep.mubr.msk.bf16.mxu1 %vm877_vm0, %v876_v0  ;;  %v496_v35 = vsel %vm127_vm1, %v491_v34, 0 }
 0x2a2   : > { %772 = vmatprep.subr.bf16.mxu1 %v876_v0 }
 0x2a4   : > { %v489_v36 = vpop.permute.xlu1 %488 }
 0x2a8   : > { %763 = vmatmul.mubr.msk.bf16.vlgmr.msra.gmra.mrb[4].mxu1 %vm127_vm1, %v247_v30 }
 0x2a9   : > { %773 = vmatpush3.bf16.xpose.msra.mxu1 %v375_v33  ;;  %774 = vmatprep.mubr.msk.bf16.mxu1 %vm877_vm0, %v876_v0 }
 0x2aa   : > { %784 = vmatprep.subr.bf16.mxu1 %v876_v0 }
 0x2b0   : > { %775 = vmatmul.mubr.msk.bf16.vlgmr.msra.gmra.mrb[8].mxu1 %vm127_vm1, %v368_v32 }
 0x2b1   : > { %785 = vmatpush3.bf16.xpose.msra.mxu1 %v496_v35  ;;  %786 = vmatprep.mubr.msk.bf16.mxu1 %vm877_vm0, %v876_v0 }
 0x2b8   : > { %787 = vmatmul.mubr.msk.bf16.vlgmr.msra.gmra.mrb[12].mxu1 %vm127_vm1, %v489_v36 }
 0x373   : > { %v960_v37 = vpop.f32.mrb[0].mxu1 }
 0x374   : > { %v758_v38 = vpop.f32.mrb[1].mxu1 }
 0x375   : > { %v962_v39 = vpop.f32.mrb[2].mxu1 }
 0x376   : > { %v759_v40 = vpop.f32.mrb[3].mxu1 }
 0x37b   : > { %v290_v41 = vpop.f32.mrb[4].mxu1 }
 0x37c   : > { %v764_v42 = vpop.f32.mrb[5].mxu1  ;;  %v297_v43 = vsel %vm175_vm2, %v290_v41, -inf }
 0x37d   : > { %298 = vmax.xlane.f32.xlu1 %v297_v43  ;;  %v293_v44 = vpop.f32.mrb[6].mxu1 }
 0x37e   : > { %v765_v45 = vpop.f32.mrb[7].mxu1  ;;  %v300_v46 = vsel %vm175_vm2, %v293_v44, -inf }
 0x37f   : > { %301 = vmax.xlane.f32.xlu0 %v300_v46 }
 0x383   : > { %v411_v47 = vpop.f32.mrb[8].mxu1 }
 0x384   : > { %v776_v48 = vpop.f32.mrb[9].mxu1  ;;  %v418_v49 = vsel %vm175_vm2, %v411_v47, -inf }
 0x385   : > { %419 = vmax.xlane.f32.xlu1 %v418_v49  ;;  %v414_v50 = vpop.f32.mrb[10].mxu1 }
 0x386   : > { %v777_v51 = vpop.f32.mrb[11].mxu1  ;;  %v421_v52 = vsel %vm175_vm2, %v414_v50, -inf }
 0x387   : > { %422 = vmax.xlane.f32.xlu0 %v421_v52 }
 0x38b   : > { %v532_v53 = vpop.f32.mrb[12].mxu1 }
 0x38c   : > { %v788_v54 = vpop.f32.mrb[13].mxu1  ;;  %v539_v55 = vsel %vm175_vm2, %v532_v53, -inf }
 0x38d   : > { %540 = vmax.xlane.f32.xlu1 %v539_v55  ;;  %v535_v56 = vpop.f32.mrb[14].mxu1 }
 0x38e   : > { %v789_v57 = vpop.f32.mrb[15].mxu1  ;;  %v542_v58 = vsel %vm175_vm2, %v535_v56, -inf }
 0x38f   : > { %543 = vmax.xlane.f32.xlu0 %v542_v58 }
 0x39e   : > { %320 = vrot.lane.b32.xlu1 %v924_v1, %s886_s20 }
 0x40a   : > { %v299_v59 = vpop.xlane.xlu1 %298 }
 0x40b   : > { %v303_v60 = vsub.f32 %v290_v41, %v299_v59 }
 0x40c   : > { %v302_v61 = vpop.xlane.xlu0 %301 }
 0x40d   : > { %v305_v62 = vmul.f32 1.442695, %v303_v60  ;;  %v304_v63 = vsub.f32 %v293_v44, %v302_v61 }
 0x40f   : > { %844 = vpow2.f32 %v305_v62  ;;  %v307_v2 = vmul.f32 1.442695, %v304_v63 }
 0x411   : > { %846 = vpow2.f32 %v307_v2 }
 0x412   : > { %v420_v3 = vpop.xlane.xlu1 %419 }
 0x413   : > { %v424_v4 = vsub.f32 %v411_v47, %v420_v3 }
 0x414   : > { %v423_v5 = vpop.xlane.xlu0 %422 }
 0x415   : > { %v426_v6 = vmul.f32 1.442695, %v424_v4  ;;  %v425_v7 = vsub.f32 %v414_v50, %v423_v5 }
 0x417   : > { %848 = vpow2.f32 %v426_v6  ;;  %v428_v8 = vmul.f32 1.442695, %v425_v7 }
 0x419   : > { %v845_v9 = vpop.eup %844  ;;  %850 = vpow2.f32 %v428_v8 }
 0x41a   : > { %v541_v10 = vpop.xlane.xlu1 %540  ;;  %v309_v11 = vsel %vm175_vm2, %v845_v9, 0.0 }
 0x41b   : > { %v847_v12 = vpop.eup %846  ;;  %v545_v13 = vsub.f32 %v532_v53, %v541_v10  ;;  %310 = vadd.xlane.f32.xlu1 %v309_v11 }
 0x41c   : > { %v544_v14 = vpop.xlane.xlu0 %543  ;;  %v312_v15 = vsel %vm175_vm2, %v847_v12, 0.0 }
 0x41d   : > { %v547_v16 = vmul.f32 1.442695, %v545_v13  ;;  %v546_v17 = vsub.f32 %v535_v56, %v544_v14  ;;  %313 = vadd.xlane.f32.xlu0 %v312_v15 }
 0x41e   : > { %v321_v18 = vpop.permute.xlu1 %320 }
 0x41f   : > { %852 = vpow2.f32 %v547_v16  ;;  %v549_v19 = vmul.f32 1.442695, %v546_v17  ;;  %767 = vmatpush3.bf16.msra.mxu0 %v321_v18 }
 0x420   : > { %778 = vmatprep.subr.bf16.mxu0 %v876_v0 }
 0x421   : > { %v849_v20 = vpop.eup %848  ;;  %854 = vpow2.f32 %v549_v19 }
 0x422   : > { %v430_v21 = vsel %vm175_vm2, %v849_v20, 0.0 }
 0x423   : > { %v851_v22 = vpop.eup %850  ;;  %431 = vadd.xlane.f32.xlu1 %v430_v21 }
 0x424   : > { %v433_v23 = vsel %vm175_vm2, %v851_v22, 0.0 }
 0x425   : > { %434 = vadd.xlane.f32.xlu0 %v433_v23 }
 0x429   : > { %v853_v24 = vpop.eup %852 }
 0x42a   : > { %v551_v25 = vsel %vm175_vm2, %v853_v24, 0.0 }
 0x42b   : > { %v855_v26 = vpop.eup %854  ;;  %552 = vadd.xlane.f32.xlu1 %v551_v25 }
 0x42c   : > { %v554_v27 = vsel %vm175_vm2, %v855_v26, 0.0 }
 0x42d   : > { %555 = vadd.xlane.f32.xlu0 %v554_v27 }
 0x43c   : > { %562 = vrot.lane.b32.xlu1 %v924_v1, %s887_s21 }
 0x443   : > { %441 = vrot.lane.b32.xlu0 %v924_v1, %s888_s22 }
 0x4a8   : > { %v311_v28 = vpop.xlane.xlu1 %310 }
 0x4a9   : > { %856 = vrcp.f32 %v311_v28 }
 0x4aa   : > { %v314_v29 = vpop.xlane.xlu0 %313 }
 0x4ab   : > { %858 = vrcp.f32 %v314_v29 }
 0x4b0   : > { %v432_v30 = vpop.xlane.xlu1 %431 }
 0x4b1   : > { %860 = vrcp.f32 %v432_v30 }
 0x4b2   : > { %v435_v31 = vpop.xlane.xlu0 %434 }
 0x4b3   : > { %v857_v32 = vpop.eup %856  ;;  %862 = vrcp.f32 %v435_v31 }
 0x4b4   : > { %v317_v34 = vmul.f32 %v857_v32, %v845_v9 }
 0x4b5   : > { %v859_v33 = vpop.eup %858 }
 0x4b6   : > { %v318_v35 = vmul.f32 %v859_v33, %v847_v12 }
 0x4b8   : > { %v553_v36 = vpop.xlane.xlu1 %552  ;;  %v319_v38 = vpack.c.bf16 %v318_v35, %v317_v34 }
 0x4b9   : > { %864 = vrcp.f32 %v553_v36 }
 0x4ba   : > { %v556_v40 = vpop.xlane.xlu0 %555  ;;  %769 = vmatmul.mubr.msk.bf16.vlgmr.msra.gmra.mrb[4].mxu0 %vm175_vm2, %v319_v38 }
 0x4bb   : > { %v861_v41 = vpop.eup %860  ;;  %866 = vrcp.f32 %v556_v40  ;;  %780 = vmatprep.mubr.msk.bf16.mxu0 %vm877_vm0, %v876_v0 }
 0x4bc   : > { %v438_v42 = vmul.f32 %v861_v41, %v849_v20  ;;  %v563_v46 = vpop.permute.xlu1 %562 }
 0x4bd   : > { %v863_v1 = vpop.eup %862 }
 0x4be   : > { %v439_v43 = vmul.f32 %v863_v1, %v851_v22  ;;  %v442_v44 = vpop.permute.xlu0 %441 }
 0x4bf   : > { %779 = vmatpush3.bf16.msra.mxu0 %v442_v44 }
 0x4c0   : > { %v440_v45 = vpack.c.bf16 %v439_v43, %v438_v42  ;;  %790 = vmatprep.subr.bf16.mxu0 %v876_v0 }
 0x4c2   : > { %781 = vmatmul.mubr.msk.bf16.vlgmr.msra.gmra.mrb[8].mxu0 %vm175_vm2, %v440_v45 }
 0x4c3   : > { %v865_v47 = vpop.eup %864  ;;  %791 = vmatpush3.bf16.msra.mxu0 %v563_v46  ;;  %792 = vmatprep.mubr.msk.bf16.mxu0 %vm877_vm0, %v876_v0 }
 0x4c4   : > { %v559_v49 = vmul.f32 %v865_v47, %v853_v24 }
 0x4c5   : > { %v867_v48 = vpop.eup %866 }
 0x4c6   : > { %v560_v50 = vmul.f32 %v867_v48, %v855_v26 }
 0x4c8   : > { %v561_v51 = vpack.c.bf16 %v560_v50, %v559_v49 }
 0x4ca   : > { %793 = vmatmul.mubr.msk.bf16.vlgmr.msra.gmra.mrb[12].mxu0 %vm175_vm2, %v561_v51 }
 0x58d   : > { %v360_v52 = vpop.f32.mrb[4].mxu0 }
 0x58e   : > { %v770_v53 = vpop.f32.mrb[5].mxu0 }
 0x58f   : > { %v363_v54 = vpop.f32.mrb[6].mxu0 }
 0x590   : > { %v820_v55 = vpack.i.bf16 %v363_v54, %v360_v52  ;;  %v771_v56 = vpop.f32.mrb[7].mxu0 }
 0x592   : > { %821 = vrot.lane.b32.xlu1 %v820_v55, %s889_s23 }
 0x595   : > { %v481_v57 = vpop.f32.mrb[8].mxu0 }
 0x596   : > { %v782_v58 = vpop.f32.mrb[9].mxu0 }
 0x597   : > { %v484_v59 = vpop.f32.mrb[10].mxu0 }
 0x598   : > { %v825_v60 = vpack.i.bf16 %v484_v59, %v481_v57  ;;  %v783_v61 = vpop.f32.mrb[11].mxu0 }
 0x59a   : > { %826 = vrot.lane.b32.xlu0 %v825_v60, %s890_s24 }
 0x59d   : > { %v602_v0 = vpop.f32.mrb[12].mxu0 }
 0x59e   : > { %v794_v62 = vpop.f32.mrb[13].mxu0 }
 0x59f   : > { %v605_v63 = vpop.f32.mrb[14].mxu0 }
 0x5a0   : > { %v830_v2 = vpack.i.bf16 %v605_v63, %v602_v0  ;;  %v795_v3 = vpop.f32.mrb[15].mxu0 }
 0x5a2   : > { %831 = vrot.lane.b32.xlu1 %v830_v2, %s891_s25 }
 0x604   : > { %v822_v4 = vpop.permute.xlu1 %821 }
 0x605   : > { %v824_v6 = vunpack.i.h.bf16 %v822_v4  ;;  %v823_v7 = vunpack.i.l.bf16 %v822_v4 }
 0x607   : > { %v634_v11 = vsel %vm127_vm1, %v962_v39, %v824_v6  ;;  %v633_v12 = vsel %vm127_vm1, %v960_v37, %v823_v7 }
 0x60c   : > { %v827_v5 = vpop.permute.xlu0 %826 }
 0x60d   : > { %v829_v8 = vunpack.i.h.bf16 %v827_v5  ;;  %v828_v9 = vunpack.i.l.bf16 %v827_v5 }
 0x60f   : > { %v636_v15 = vsel %vm175_vm2, %v634_v11, %v829_v8  ;;  %v635_v16 = vsel %vm175_vm2, %v633_v12, %v828_v9 }
 0x614   : > { %v832_v10 = vpop.permute.xlu1 %831 }
 0x615   : > { %v834_v13 = vunpack.i.h.bf16 %v832_v10  ;;  %v833_v14 = vunpack.i.l.bf16 %v832_v10 }
 0x617   : > { %v639_v17 = vsel %vm637_vm3, %v636_v15, %v834_v13  ;;  %v638_v18 = vsel %vm637_vm3, %v635_v16, %v833_v14 }
 0x618   : > { %v731_v19 = vpack.c.bf16 %v639_v17, %v639_v17  ;;  %v730_v20 = vpack.c.bf16 %v638_v18, %v638_v18 }
 0x61a   : > { %650 = vst.msk [vmem:[%s116_s28 + $0x4] sm:$0xf] %vm648_vm4, %v731_v19  ;;  %649 = vst.msk [vmem:[%s116_s28] sm:$0xf] %vm648_vm4, %v730_v20 }
 0x61b PF: > { %s11_s6 = sadd.s32 1, %s874_s6  }
 0x61c   : > { %p8_p4 = scmp.ge.s32.totalorder %s11_s6, 4  }
 0x61e   :  { %10 = sbr.rel (!%p8_p4) target bundleno = 1 (0x1), region = 54 }

// kernel: frozen_bert_forward.15
= control target key start
LH: loop header
LB: loop body
LE: loop exit
PB: predicated region body
PF: predicated region fallthrough
CT: control target
= control target key end

     0   :  { %s405_s12 = smov 0   ;;  %s431_s0 = inlined_call_operand.vmem [shape: bf16[32,32], index: 0, kind: input, shape index: {}]   ;;  %s432_s1 = inlined_call_operand.vmem [shape: bf16[32,64], index: 1, kind: input, shape index: {}]   ;;  %s433_s2 = inlined_call_operand.vmem [shape: f32[1,64], index: 2, kind: input, shape index: {}]   ;;  %s434_s3 = inlined_call_operand.vmem [shape: bf16[32,64], index: 3, kind: output, shape index: {}]  }
   0x1 LB: > { %s327_s13 = sadd.s32 4294967295, %s381_s12   ;;  %p331_p0 = scmp.ge.s32.totalorder %s381_s12, 1  ;;  %s381_s12 = sphi %s405_s12, %s13_s12  }
   0x2   : > { %p138_p1 = scmp.lt.s32.totalorder %s381_s12, 3 }
   0x4   : > { %p139_p2 = pnand %p331_p0, %p138_p1 }
   0x5   : > { %v368_v0 = vld [vmem:[%s432_s1] sm:$0xff] (!%p139_p2)   ;;  %v383_v1 = vmov (!%p139_p2), 0.0   ;;  %v369_v2 = vld [vmem:[%s432_s1 + $0x8] sm:$0xff] (!%p139_p2)   ;;  %vm384_vm0 = vmmov (!%p139_p2), 0   ;;  %s332_s18 = sshll.u32 (!%p139_p2), %s327_s13, 1  ;;  %vm205_vm1 = vcmask (!%p139_p2), 261120  }
   0x6   : > { %142 = sbr.rel (%p139_p2) target bundleno = 253 (0xfd), region = 32  ;;  %350 = vmatprep.subr.bf16.mxu0 (!%p139_p2), %v383_v1  ;;  %354 = vmatprep.mubr.msk.bf16.mxu0 (!%p139_p2), %vm384_vm0, %v383_v1  ;;  %p163_p3 = scmp.lt.s32.totalorder (!%p139_p2), %s332_s18, 3  ;;  %v336_v4 = vld [vmem:[%s433_s2] ss:$0 sm:$0xff] (!%p139_p2)  ;;  %vm268_vm2 = vcmask (!%p139_p2), 519168  }
   0x7   : > { %351 = vmatpush3.bf16.msra.mxu0 (!%p139_p2), %v368_v0 }
   0x8   : > { %352 = vmatprep.subr.bf16.mxu0 (!%p139_p2), %v383_v1 }
   0xb   : > { %353 = vmatpush3.bf16.msra.mxu0 (!%p139_p2), %v369_v2 }
   0xd   : > { %s436_s18 = smov (!%p163_p3, %s332_s18), 3 }
   0xe   : > { %s333_s19 = sshll.u32 %s436_s18, 2 }
   0xf   : > { %s166_s22 = scalar_lea.vmem %s431_s0, %s333_s19  ;;  %s172_s27 = scalar_lea.vmem %s434_s3, %s333_s19 }
  0x10   : > { %v370_v3 = vld [vmem:[%s166_s22] sm:$0xff]  }
  0x11   : > { %355 = vmatmul.mubr.msk.bf16.vlgmr.msra.gmra.mrb[0].mxu0 %vm205_vm1, %v370_v3 }
  0xe4   : > { %v243_v5 = vpop.f32.mrb[0].mxu0 }
  0xe5   : > { %v244_v6 = vadd.f32 %v336_v4, %v243_v5  ;;  %v356_v7 = vpop.f32.mrb[1].mxu0 }
  0xe6   : > { %v246_v8 = vpop.f32.mrb[2].mxu0 }
  0xe7   : > { %v252_v9 = vmul.f32 0.70710677, %v244_v6  ;;  %v247_v10 = vadd.f32 %v336_v4, %v246_v8  ;;  %v357_v11 = vpop.f32.mrb[3].mxu0  ;;  %v250_v14 = vmul.f32 0.5, %v244_v6 }
  0xe9   : > { %371 = verf.f32 %v252_v9  ;;  %v253_v12 = vmul.f32 0.70710677, %v247_v10  ;;  %v251_v18 = vmul.f32 0.5, %v247_v10 }
  0xeb   : > { %373 = verf.f32 %v253_v12 }
  0xf3   : > { %v372_v13 = vpop.eup %371 }
  0xf4   : > { %v256_v15 = vadd.f32 1.0, %v372_v13 }
  0xf5   : > { %v374_v16 = vpop.eup %373 }
  0xf6   : > { %v258_v17 = vmul.f32 %v256_v15, %v250_v14  ;;  %v257_v19 = vadd.f32 1.0, %v374_v16 }
  0xf8   : > { %v345_v20 = vpack.c.bf16 %v258_v17, %v258_v17  ;;  %v259_v21 = vmul.f32 %v257_v19, %v251_v18 }
  0xfa   : > { %269 = vst.msk [vmem:[%s172_s27] sm:$0xf] %vm268_vm2, %v345_v20  ;;  %v346_v22 = vpack.c.bf16 %v259_v21, %v259_v21 }
  0xfc   : > { %270 = vst.msk [vmem:[%s172_s27 + $0x4] sm:$0xf] %vm268_vm2, %v346_v22 }
  0xfd PF: > { %s13_s12 = sadd.s32 1, %s381_s12  }
  0xfe   : > { %p10_p4 = scmp.ge.s32.totalorder %s13_s12, 4  }
 0x100   :  { %12 = sbr.rel (!%p10_p4) target bundleno = 1 (0x1), region = 62 }

// kernel: frozen_bert_forward.16
= control target key start
LH: loop header
LB: loop body
LE: loop exit
PB: predicated region body
PF: predicated region fallthrough
CT: control target
= control target key end

     0   :  { %s611_s21 = smov 0   ;;  %s661_s0 = inlined_call_operand.vmem [shape: bf16[32,64], index: 0, kind: input, shape index: {}]   ;;  %s662_s1 = inlined_call_operand.vmem [shape: bf16[64,32], index: 1, kind: input, shape index: {}]   ;;  %s663_s2 = inlined_call_operand.vmem [shape: f32[1,32], index: 2, kind: input, shape index: {}]   ;;  %s664_s3 = inlined_call_operand.vmem [shape: bf16[32,32], index: 3, kind: input, shape index: {}]   ;;  %s665_s4 = inlined_call_operand.vmem [shape: f32[1,32], index: 4, kind: input, shape index: {}]   ;;  %s666_s5 = inlined_call_operand.vmem [shape: f32[1,32], index: 5, kind: input, shape index: {}]   ;;  %s667_s6 = inlined_call_operand.vmem [shape: bf16[32,32], index: 6, kind: output, shape index: {}]  }
   0x1 LB: > { %s500_s22 = sadd.s32 4294967295, %s572_s21   ;;  %p504_p0 = scmp.ge.s32.totalorder %s572_s21, 1  ;;  %s572_s21 = sphi %s611_s21, %s16_s21  }
   0x2   : > { %p224_p1 = scmp.lt.s32.totalorder %s572_s21, 3 }
   0x4   : > { %p225_p2 = pnand %p504_p0, %p224_p1 }
   0x5   : > { %v557_v0 = vld [vmem:[%s662_s1] sm:$0xff] (!%p225_p2)   ;;  %v574_v1 = vmov (!%p225_p2), 0.0   ;;  %v558_v2 = vld [vmem:[%s662_s1 + $0x8] sm:$0xff] (!%p225_p2)   ;;  %vm575_vm0 = vmmov (!%p225_p2), 0   ;;  %s505_s27 = sshll.u32 (!%p225_p2), %s500_s22, 1  ;;  %v559_v3 = vld [vmem:[%s662_s1 + $0x10] sm:$0xff] (!%p225_p2)  }
   0x6   : > { %228 = sbr.rel (%p225_p2) target bundleno = 558 (0x22e), region = 44  ;;  %535 = vmatprep.subr.bf16.mxu0 (!%p225_p2), %v574_v1  ;;  %543 = vmatprep.mubr.msk.bf16.mxu0 (!%p225_p2), %vm575_vm0, %v574_v1  ;;  %p260_p3 = scmp.lt.s32.totalorder (!%p225_p2), %s505_s27, 3  ;;  %v560_v4 = vld [vmem:[%s662_s1 + $0x18] sm:$0xff] (!%p225_p2)   ;;  %vm324_vm1 = vcmask (!%p225_p2), 523264   ;;  %v511_v7 = vld [vmem:[%s663_s2] ss:$0 sm:$0xff] (!%p225_p2) }
   0x7   : > { %536 = vmatpush3.bf16.msra.mxu0 (!%p225_p2), %v557_v0  ;;  %vm375_vm2 = vcmask (!%p225_p2), 261120   ;;  %v518_v37 = vld [vmem:[%s665_s4] ss:$0 sm:$0xff] (!%p225_p2)  ;;  %vm429_vm3 = vcmask (!%p225_p2), 257024  }
   0x8   : > { %537 = vmatprep.subr.bf16.mxu0 (!%p225_p2), %v574_v1  ;;  %v519_v39 = vld [vmem:[%s666_s5] ss:$0 sm:$0xff] (!%p225_p2) }
   0xb   : > { %538 = vmatpush3.bf16.msra.mxu0 (!%p225_p2), %v558_v2 }
   0xc   : > { %539 = vmatprep.subr.bf16.mxu0 (!%p225_p2), %v574_v1 }
   0xd   : > { %s669_s27 = smov (!%p260_p3, %s505_s27), 3 }
   0xe   : > { %s628_s30 = sshll.u32 %s669_s27, 2 }
   0xf   : > { %s263_s9 = scalar_lea.vmem %s661_s0, %s628_s30  ;;  %540 = vmatpush3.bf16.msra.mxu0 %v559_v3  ;;  %s269_s14 = scalar_lea.vmem %s664_s3, %s628_s30 }
  0x10   : > { %541 = vmatprep.subr.bf16.mxu0 %v574_v1  ;;  %v561_v5 = vld [vmem:[%s263_s9] sm:$0xff]   ;;  %s275_s24 = scalar_lea.vmem %s667_s6, %s628_s30 }
  0x11   : > { %v527_v6 = vld [vmem:[%s269_s14] sm:$0xff]  }
  0x12   : > { %v528_v8 = vunpack.c.l.bf16 %v527_v6  ;;  %v529_v12 = vunpack.c.h.bf16 %v527_v6 }
  0x13   : > { %542 = vmatpush3.bf16.msra.mxu0 %v560_v4 }
  0x16   : > { %544 = vmatmul.mubr.msk.bf16.vlgmr.msra.gmra.mrb[0].mxu0 %vm324_vm1, %v561_v5 }
  0xe9   : > { %v362_v9 = vpop.f32.mrb[0].mxu0 }
  0xea   : > { %v363_v10 = vadd.f32 %v511_v7, %v362_v9  ;;  %v545_v11 = vpop.f32.mrb[1].mxu0 }
  0xeb   : > { %v365_v13 = vpop.f32.mrb[2].mxu0 }
  0xec   : > { %v366_v14 = vadd.f32 %v511_v7, %v365_v13  ;;  %v546_v15 = vpop.f32.mrb[3].mxu0  ;;  %v373_v16 = vadd.f32 %v528_v8, %v363_v10 }
  0xee   : > { %v376_v17 = vsel %vm375_vm2, %v373_v16, 0.0  ;;  %v374_v18 = vadd.f32 %v529_v12, %v366_v14 }
  0xef   : > { %377 = vadd.xlane.f32.xlu0 %v376_v17 }
  0xf0   : > { %v379_v19 = vsel %vm375_vm2, %v374_v18, 0.0 }
  0xf3   : > { %380 = vadd.xlane.f32.xlu0 %v379_v19 }
 0x17c   : > { %v378_v20 = vpop.xlane.xlu0 %377 }
 0x17d   : > { %v383_v21 = vmul.f32 0.03125, %v378_v20 }
 0x17f   : > { %v385_v22 = vsub.f32 %v373_v16, %v383_v21 }
 0x180   : > { %v381_v23 = vpop.xlane.xlu0 %380 }
 0x181   : > { %v384_v24 = vmul.f32 0.03125, %v381_v23  ;;  %v387_v25 = vmul.f32 %v385_v22, %v385_v22 }
 0x183   : > { %v386_v26 = vsub.f32 %v374_v18, %v384_v24  ;;  %v389_v27 = vsel %vm375_vm2, %v387_v25, 0.0 }
 0x184   : > { %390 = vadd.xlane.f32.xlu1 %v389_v27 }
 0x185   : > { %v388_v28 = vmul.f32 %v386_v26, %v386_v26 }
 0x187   : > { %v392_v29 = vsel %vm375_vm2, %v388_v28, 0.0 }
 0x188   : > { %393 = vadd.xlane.f32.xlu1 %v392_v29 }
 0x211   : > { %v391_v30 = vpop.xlane.xlu1 %390 }
 0x212   : > { %v395_v31 = vmul.f32 0.03125, %v391_v30 }
 0x214   : > { %v397_v32 = vadd.f32 1e-12, %v395_v31 }
 0x215   : > { %v394_v33 = vpop.xlane.xlu1 %393 }
 0x216   : > { %562 = vrsqrt.f32 %v397_v32  ;;  %v396_v34 = vmul.f32 0.03125, %v394_v33 }
 0x218   : > { %v398_v35 = vadd.f32 1e-12, %v396_v34 }
 0x21a   : > { %564 = vrsqrt.f32 %v398_v35 }
 0x220   : > { %v563_v36 = vpop.eup %562 }
 0x221   : > { %v401_v38 = vmul.f32 %v563_v36, %v385_v22 }
 0x223   : > { %v410_v40 = vmul.f32 %v518_v37, %v401_v38 }
 0x224   : > { %v565_v41 = vpop.eup %564 }
 0x225   : > { %v419_v42 = vadd.f32 %v519_v39, %v410_v40  ;;  %v402_v43 = vmul.f32 %v565_v41, %v386_v26 }
 0x227   : > { %v524_v44 = vpack.c.bf16 %v419_v42, %v419_v42  ;;  %v411_v45 = vmul.f32 %v518_v37, %v402_v43 }
 0x229   : > { %430 = vst.msk [vmem:[%s275_s24] sm:$0xf] %vm429_vm3, %v524_v44  ;;  %v420_v46 = vadd.f32 %v519_v39, %v411_v45 }
 0x22b   : > { %v525_v47 = vpack.c.bf16 %v420_v46, %v420_v46 }
 0x22d   : > { %431 = vst.msk [vmem:[%s275_s24 + $0x4] sm:$0xf] %vm429_vm3, %v525_v47 }
 0x22e PF: > { %s16_s21 = sadd.s32 1, %s572_s21  }
 0x22f   : > { %p13_p4 = scmp.ge.s32.totalorder %s16_s21, 4  }
 0x231   :  { %15 = sbr.rel (!%p13_p4) target bundleno = 1 (0x1), region = 77 }

</bundles_post_ra>
